<compile_context>
chip_gen: v6e
topology: v6e:2x2x1
jax: 0.10.0
libtpu: 0.0.40
codegen_flags: <defaults>
</compile_context>

<pallas_src>
import jax
import jax.numpy as jnp
import numpy as np
from jax.experimental import pallas as pl
from jax.experimental.pallas import tpu as pltpu


# -----------------------------------------------------------------------------
# Pallas kernel 1: fused fc0 -> fc1 (bias added in-kernel; no activation, as in
# the PyTorch spec `self.fc1(self.fc0(z))`).
# -----------------------------------------------------------------------------
def _fc_fused_kernel(z_ref, w0_ref, b0_ref, w1_ref, b1_ref, o_ref):
    h = jnp.dot(z_ref[...], w0_ref[...], preferred_element_type=jnp.float32) + b0_ref[...]
    y = jnp.dot(h, w1_ref[...], preferred_element_type=jnp.float32) + b1_ref[...]
    o_ref[...] = y.astype(o_ref.dtype)


def fc_fused(z, w0, b0_row, w1, b1_row):
    B, L = z.shape
    Hs = w0.shape[1]
    F = w1.shape[1]
    return pl.pallas_call(
        _fc_fused_kernel,
        out_shape=jax.ShapeDtypeStruct((B, F), jnp.float32),
        grid=(1,),
        in_specs=[
            pl.BlockSpec((B, L), lambda i: (0, 0)),
            pl.BlockSpec((L, Hs), lambda i: (0, 0)),
            pl.BlockSpec((1, Hs), lambda i: (0, 0)),
            pl.BlockSpec((Hs, F), lambda i: (0, 0)),
            pl.BlockSpec((1, F), lambda i: (0, 0)),
        ],
        out_specs=pl.BlockSpec((B, F), lambda i: (0, 0)),
    )(z, w0, b0_row, w1, b1_row)


# -----------------------------------------------------------------------------
# Pallas kernel 2: lane-dense matmul  Y = X @ W   (X: (M, Ci), W: (Ci, Npad),
# Npad a multiple of 128).  This is the conv hot path: each row of Y is one
# input voxel's contribution to all 27 taps x Co output channels.
# -----------------------------------------------------------------------------
def _matmul_kernel(x_ref, w_ref, o_ref):
    o_ref[...] = jnp.dot(
        x_ref[...], w_ref[...], preferred_element_type=jnp.float32
    ).astype(o_ref.dtype)


def matmul_lane_dense(x, w, tm_max=512):
    M, K = x.shape
    K2, N = w.shape
    assert K == K2
    assert N % 128 == 0, "packed conv weight must be lane-padded to a multiple of 128"
    tm = min(M, tm_max)
    grid = (pl.cdiv(M, tm),)  # partial tail block handled by Pallas masking
    return pl.pallas_call(
        _matmul_kernel,
        out_shape=jax.ShapeDtypeStruct((M, N), jnp.float32),
        grid=grid,
        in_specs=[
            pl.BlockSpec((tm, K), lambda i: (i, 0)),
            pl.BlockSpec((K, N), lambda i: (0, 0)),
        ],
        out_specs=pl.BlockSpec((tm, N), lambda i: (i, 0)),
        compiler_params=pltpu.CompilerParams(dimension_semantics=("parallel",)),
    )(x, w)


# -----------------------------------------------------------------------------
# ConvTranspose3d (k=3, pad=1) in scatter form:
#   Pallas GEMM over (voxels x Ci) @ (Ci x 27*Co), then a cheap XLA-fused
#   recombination (shifted adds), bias and activation.
# For stride=2 (output_padding=1) the recombination is the sub-pixel / parity
# decomposition: even output index uses tap k=1, odd uses taps k in {0, 2}.
# -----------------------------------------------------------------------------
def _combine_stride2(Yr):
    """Yr: (B, D, H, W, 3, 3, 3, Co) -> (B, 2D, 2H, 2W, Co)."""
    B, D, H, W = Yr.shape[:4]
    Co = Yr.shape[-1]
    # zero plane at the end of each spatial dim for the (k=0, shift +1) taps
    Yp = jnp.pad(Yr, ((0, 0), (0, 1), (0, 1), (0, 1), (0, 0), (0, 0), (0, 0), (0, 0)))
    taps = {0: ((1, 0),), 1: ((2, 0), (0, 1))}  # parity -> ((kernel tap, input shift), ...)
    parts = []
    for pd in (0, 1):
        for ph in (0, 1):
            for pw in (0, 1):
                acc = None
                for kd, sd in taps[pd]:
                    for kh, sh in taps[ph]:
                        for kw, sw in taps[pw]:
                            t = Yp[:, sd:sd + D, sh:sh + H, sw:sw + W, kd, kh, kw, :]
                            acc = t if acc is None else acc + t
                parts.append(acc)
    out = jnp.stack(parts, axis=0).reshape(2, 2, 2, B, D, H, W, Co)
    # interleave parities into the spatial dims: out[b, 2d+pd, 2h+ph, 2w+pw, co]
    out = jnp.transpose(out, (3, 4, 0, 5, 1, 6, 2, 7)).reshape(B, 2 * D, 2 * H, 2 * W, Co)
    return out


def _combine_stride1(Yr):
    """Yr: (B, D, H, W, 3, 3, 3, Co) -> (B, D, H, W, Co)."""
    B, D, H, W = Yr.shape[:4]
    Co = Yr.shape[-1]
    Yp = jnp.pad(Yr, ((0, 0), (1, 1), (1, 1), (1, 1), (0, 0), (0, 0), (0, 0), (0, 0)))
    out = None
    for kd in range(3):
        for kh in range(3):
            for kw in range(3):
                t = Yp[:, 2 - kd:2 - kd + D, 2 - kh:2 - kh + H, 2 - kw:2 - kw + W,
                       kd, kh, kw, :]
                out = t if out is None else out + t
    return out


def conv_transpose3d_scatter(x, wm_pad, bias_bcast, stride, act, co):
    """x: (B, D, H, W, Ci) channels-last.  wm_pad: (Ci, Npad) packed GEMM weight."""
    B, D, H, W, Ci = x.shape
    M = B * D * H * W
    X = x.reshape(M, Ci)
    Y = matmul_lane_dense(X, wm_pad)                       # (M, Npad)  -- Pallas hot path
    Yr = Y[:, :27 * co].reshape(B, D, H, W, 3, 3, 3, co)
    out = _combine_stride2(Yr) if stride == 2 else _combine_stride1(Yr)
    out = out + bias_bcast
    if act == "relu":
        out = jnp.maximum(out, 0.0)
    else:
        out = jax.nn.sigmoid(out)
    return out


# -----------------------------------------------------------------------------
# Decoder module (deterministic synthetic parameters)
# -----------------------------------------------------------------------------
class PallasDecoder:
    def __init__(self, output_size, channels, hidden_size, latent_size, key):
        assert len(output_size) == 3
        assert len(channels) > 0
        self.channels = list(channels)
        self.lowest_resolution = [output_size[i] // (2 ** len(channels)) for i in range(3)]
        fc_feature_size = (
            output_size[0] * output_size[1] * output_size[2] * channels[0]
        ) // (8 ** len(channels))

        keys = jax.random.split(key, 16)
        ki = iter(range(16))

        def uinit(k, shape, fan_in):
            bound = 1.0 / np.sqrt(fan_in)
            return jax.random.uniform(k, shape, jnp.float32, -bound, bound)

        # fc0: latent -> hidden ; fc1: hidden -> fc_feature_size
        self.w0 = uinit(keys[next(ki)], (latent_size, hidden_size), latent_size)
        self.b0 = uinit(keys[next(ki)], (hidden_size,), latent_size)
        self.w1 = uinit(keys[next(ki)], (hidden_size, fc_feature_size), hidden_size)
        self.b1 = uinit(keys[next(ki)], (fc_feature_size,), hidden_size)
        self.b0_row = self.b0.reshape(1, -1)   # hoisted once
        self.b1_row = self.b1.reshape(1, -1)

        # ConvTranspose3d stack (PyTorch weight layout (Ci, Co, 3, 3, 3)).
        conv_defs = [(channels[0], channels[0], 2, 1, "relu")]
        for i, ch in enumerate(channels):
            if i == len(channels) - 1:
                conv_defs.append((ch, 1, 1, 0, "sigmoid"))
            else:
                conv_defs.append((ch, channels[i + 1], 2, 1, "relu"))

        self.convs = []
        for (ci, co, stride, out_pad, act) in conv_defs:
            w = uinit(keys[next(ki)], (ci, co, 3, 3, 3), ci * 27)
            b = uinit(keys[next(ki)], (co,), ci * 27)
            # Pack GEMM weight once: (Ci, 27*Co), tap order (kd,kh,kw) major,
            # zero-padded on N to a multiple of 128 for lane-dense stores.
            npad = -(-(27 * co) // 128) * 128
            wm = jnp.transpose(w, (0, 2, 3, 4, 1)).reshape(ci, 27 * co)
            wm_pad = jnp.pad(wm, ((0, 0), (0, npad - 27 * co)))
            self.convs.append(dict(
                w=w, b=b, wm_pad=wm_pad, b_bcast=b.reshape(1, 1, 1, 1, co),
                stride=stride, out_pad=out_pad, act=act, co=co,
            ))

    def forward(self, z):
        x = fc_fused(z, self.w0, self.b0_row, self.w1, self.b1_row)   # single Pallas call
        B = z.shape[0]
        C0 = self.channels[0]
        ld, lh, lw = self.lowest_resolution
        # PyTorch view(-1, C0, ld, lh, lw), then channels-last for the conv path.
        x = x.reshape(B, C0, ld, lh, lw).transpose(0, 2, 3, 4, 1)     # NDHWC
        for spec in self.convs:
            x = conv_transpose3d_scatter(
                x, spec["wm_pad"], spec["b_bcast"], spec["stride"], spec["act"], spec["co"]
            )
        return x.transpose(0, 4, 1, 2, 3)                             # NCDHW: (B, 1, D, H, W)


# -----------------------------------------------------------------------------
# Pure-numpy reference (direct scatter definition of ConvTranspose3d)
# -----------------------------------------------------------------------------
def _ref_conv_transpose3d(x, w, b, stride, pad, out_pad):
    # x: (B, Ci, D, H, W), w: (Ci, Co, 3, 3, 3)
    B, Ci, D, H, W = x.shape
    Co = w.shape[1]
    k = 3
    Dn, Hn, Wn = (D - 1) * stride + k, (H - 1) * stride + k, (W - 1) * stride + k
    full = np.zeros((B, Co, Dn, Hn, Wn), np.float32)
    for kd in range(3):
        for kh in range(3):
            for kw in range(3):
                contrib = np.einsum("bcijl,co->boijl", x, w[:, :, kd, kh, kw])
                full[:, :,
                     kd:kd + stride * (D - 1) + 1:stride,
                     kh:kh + stride * (H - 1) + 1:stride,
                     kw:kw + stride * (W - 1) + 1:stride] += contrib
    Do = (D - 1) * stride - 2 * pad + k + out_pad
    Ho = (H - 1) * stride - 2 * pad + k + out_pad
    Wo = (W - 1) * stride - 2 * pad + k + out_pad
    out = full[:, :, pad:pad + Do, pad:pad + Ho, pad:pad + Wo]
    return out + b.reshape(1, Co, 1, 1, 1)


def ref_forward(dec: PallasDecoder, z):
    w0, b0 = np.asarray(dec.w0), np.asarray(dec.b0)
    w1, b1 = np.asarray(dec.w1), np.asarray(dec.b1)
    z = np.asarray(z)
    x = z @ w0 + b0
    x = x @ w1 + b1
    B = z.shape[0]
    C0 = dec.channels[0]
    ld, lh, lw = dec.lowest_resolution
    x = x.reshape(B, C0, ld, lh, lw)
    for spec in dec.convs:
        x = _ref_conv_transpose3d(
            x, np.asarray(spec["w"]), np.asarray(spec["b"]),
            spec["stride"], 1, spec["out_pad"],
        )
        if spec["act"] == "relu":
            x = np.maximum(x, 0.0)
        else:
            x = 1.0 / (1.0 + np.exp(-x))
    return x


# -----------------------------------------------------------------------------
if __name__ == "__main__":
    output_size = (16, 16, 16)
    channels = (8, 4)
    hidden_size = 32
    latent_size = 16
    batch = 2

    key = jax.random.PRNGKey(0)
    k_param, k_data = jax.random.split(key)
    dec = PallasDecoder(output_size, channels, hidden_size, latent_size, k_param)

    z = jax.random.normal(k_data, (batch, latent_size), jnp.float32)

    fwd = jax.jit(dec.forward)   # lets XLA fuse the recombination/bias/act glue
    out = fwd(z)
    out = jax.block_until_ready(out)

    assert out.shape == (batch, 1, *output_size), out.shape

    ref = ref_forward(dec, z)
    np.testing.assert_allclose(np.asarray(out), ref, rtol=1e-4, atol=1e-4)

    print("KERNEL_OK")
</pallas_src>

<mosaic_0001>
module attributes {stable_mosaic.version = 11 : i64} {
  func.func @_matmul_kernel(%arg0: i32, %arg1: memref<128x8xf32, #tpu.memory_space<vmem>>, %arg2: memref<8x256xf32, #tpu.memory_space<vmem>>, %arg3: memref<128x256xf32, #tpu.memory_space<vmem>>) attributes {dimension_semantics = [#tpu.dimension_semantics<parallel>], iteration_bounds = array<i64: 1>, scalar_prefetch = 0 : i64, scratch_operands = 0 : i64, tpu.core_type = #tpu.core_type<tc>, window_params = [{transform_indices = @transform_0, window_bounds = array<i64: 128, 8>}, {pipeline_mode = #tpu.pipeline_mode<synchronous>, transform_indices = @transform_1, window_bounds = array<i64: 8, 256>}, {transform_indices = @transform_2, window_bounds = array<i64: 128, 256>}]} {
    %c0 = arith.constant 0 : index
    %c0_0 = arith.constant 0 : index
    %0 = vector.load %arg1[%c0, %c0_0] : memref<128x8xf32, #tpu.memory_space<vmem>>, vector<128x8xf32>
    %c0_1 = arith.constant 0 : index
    %c0_2 = arith.constant 0 : index
    %1 = vector.load %arg2[%c0_1, %c0_2] : memref<8x256xf32, #tpu.memory_space<vmem>>, vector<8x256xf32>
    %cst = arith.constant dense<0.000000e+00> : vector<128x256xf32>
    %2 = tpu.matmul %0, %1, %cst {dimension_numbers = #tpu.dot_dimension_numbers<[1], [0], [0], [1], [0, 0, 1, 1], [], []>} : vector<128x8xf32>, vector<8x256xf32>, vector<128x256xf32> -> vector<128x256xf32>
    %c0_3 = arith.constant 0 : index
    %c0_4 = arith.constant 0 : index
    %3 = vector.load %arg3[%c0_3, %c0_4] : memref<128x256xf32, #tpu.memory_space<vmem>>, vector<128x256xf32>
    tpu.vector_store %arg3[%c0_3, %c0_4], %2 {strides = array<i32>} : memref<128x256xf32, #tpu.memory_space<vmem>>, vector<128x256xf32>,
    return
  }
  func.func @transform_0(%arg0: i32) -> (i32, i32) {
    %c0_i32 = arith.constant 0 : i32
    %c0_i32_0 = arith.constant 0 : i32
    return %arg0, %c0_i32 : i32, i32
  }
  func.func @transform_1(%arg0: i32) -> (i32, i32) {
    %c0_i32 = arith.constant 0 : i32
    %c0_i32_0 = arith.constant 0 : i32
    %c0_i32_1 = arith.constant 0 : i32
    return %c0_i32, %c0_i32_0 : i32, i32
  }
  func.func @transform_2(%arg0: i32) -> (i32, i32) {
    %c0_i32 = arith.constant 0 : i32
    %c0_i32_0 = arith.constant 0 : i32
    return %arg0, %c0_i32 : i32, i32
  }
}

module attributes {stable_mosaic.version = 11 : i64} {
  func.func @_fc_fused_kernel(%arg0: i32, %arg1: memref<2x16xf32, #tpu.memory_space<vmem>>, %arg2: memref<16x32xf32, #tpu.memory_space<vmem>>, %arg3: memref<1x32xf32, #tpu.memory_space<vmem>>, %arg4: memref<32x512xf32, #tpu.memory_space<vmem>>, %arg5: memref<1x512xf32, #tpu.memory_space<vmem>>, %arg6: memref<2x512xf32, #tpu.memory_space<vmem>>) attributes {dimension_semantics = [#tpu.dimension_semantics<arbitrary>], iteration_bounds = array<i64: 1>, scalar_prefetch = 0 : i64, scratch_operands = 0 : i64, tpu.core_type = #tpu.core_type<tc>, window_params = [{pipeline_mode = #tpu.pipeline_mode<synchronous>, transform_indices = @transform_0, window_bounds = array<i64: 2, 16>}, {pipeline_mode = #tpu.pipeline_mode<synchronous>, transform_indices = @transform_1, window_bounds = array<i64: 16, 32>}, {pipeline_mode = #tpu.pipeline_mode<synchronous>, transform_indices = @transform_2, window_bounds = array<i64: 1, 32>}, {pipeline_mode = #tpu.pipeline_mode<synchronous>, transform_indices = @transform_3, window_bounds = array<i64: 32, 512>}, {pipeline_mode = #tpu.pipeline_mode<synchronous>, transform_indices = @transform_4, window_bounds = array<i64: 1, 512>}, {pipeline_mode = #tpu.pipeline_mode<synchronous>, transform_indices = @transform_5, window_bounds = array<i64: 2, 512>}]} {
    %c0 = arith.constant 0 : index
    %c0_0 = arith.constant 0 : index
    %0 = vector.load %arg1[%c0, %c0_0] : memref<2x16xf32, #tpu.memory_space<vmem>>, vector<2x16xf32>
    %c0_1 = arith.constant 0 : index
    %c0_2 = arith.constant 0 : index
    %1 = vector.load %arg2[%c0_1, %c0_2] : memref<16x32xf32, #tpu.memory_space<vmem>>, vector<16x32xf32>
    %cst = arith.constant dense<0.000000e+00> : vector<2x32xf32>
    %2 = tpu.matmul %0, %1, %cst {dimension_numbers = #tpu.dot_dimension_numbers<[1], [0], [0], [1], [0, 0, 1, 1], [], []>} : vector<2x16xf32>, vector<16x32xf32>, vector<2x32xf32> -> vector<2x32xf32>
    %c0_3 = arith.constant 0 : index
    %c0_4 = arith.constant 0 : index
    %3 = vector.load %arg3[%c0_3, %c0_4] : memref<1x32xf32, #tpu.memory_space<vmem>>, vector<1x32xf32>
    %4 = vector.broadcast %3 : vector<1x32xf32> to vector<2x32xf32>
    %5 = arith.addf %2, %4 : vector<2x32xf32>
    %c0_5 = arith.constant 0 : index
    %c0_6 = arith.constant 0 : index
    %6 = vector.load %arg4[%c0_5, %c0_6] : memref<32x512xf32, #tpu.memory_space<vmem>>, vector<32x512xf32>
    %cst_7 = arith.constant dense<0.000000e+00> : vector<2x512xf32>
    %7 = tpu.matmul %5, %6, %cst_7 {dimension_numbers = #tpu.dot_dimension_numbers<[1], [0], [0], [1], [0, 0, 1, 1], [], []>} : vector<2x32xf32>, vector<32x512xf32>, vector<2x512xf32> -> vector<2x512xf32>
    %c0_8 = arith.constant 0 : index
    %c0_9 = arith.constant 0 : index
    %8 = vector.load %arg5[%c0_8, %c0_9] : memref<1x512xf32, #tpu.memory_space<vmem>>, vector<1x512xf32>
    %9 = vector.broadcast %8 : vector<1x512xf32> to vector<2x512xf32>
    %10 = arith.addf %7, %9 : vector<2x512xf32>
    %c0_10 = arith.constant 0 : index
    %c0_11 = arith.constant 0 : index
    %11 = vector.load %arg6[%c0_10, %c0_11] : memref<2x512xf32, #tpu.memory_space<vmem>>, vector<2x512xf32>
    tpu.vector_store %arg6[%c0_10, %c0_11], %10 {strides = array<i32>} : memref<2x512xf32, #tpu.memory_space<vmem>>, vector<2x512xf32>,
    return
  }
  func.func @transform_0(%arg0: i32) -> (i32, i32) {
    %c0_i32 = arith.constant 0 : i32
    %c0_i32_0 = arith.constant 0 : i32
    %c0_i32_1 = arith.constant 0 : i32
    return %c0_i32, %c0_i32_0 : i32, i32
  }
  func.func @transform_1(%arg0: i32) -> (i32, i32) {
    %c0_i32 = arith.constant 0 : i32
    %c0_i32_0 = arith.constant 0 : i32
    %c0_i32_1 = arith.constant 0 : i32
    return %c0_i32, %c0_i32_0 : i32, i32
  }
  func.func @transform_2(%arg0: i32) -> (i32, i32) {
    %c0_i32 = arith.constant 0 : i32
    %c0_i32_0 = arith.constant 0 : i32
    %c0_i32_1 = arith.constant 0 : i32
    return %c0_i32, %c0_i32_0 : i32, i32
  }
  func.func @transform_3(%arg0: i32) -> (i32, i32) {
    %c0_i32 = arith.constant 0 : i32
    %c0_i32_0 = arith.constant 0 : i32
    %c0_i32_1 = arith.constant 0 : i32
    return %c0_i32, %c0_i32_0 : i32, i32
  }
  func.func @transform_4(%arg0: i32) -> (i32, i32) {
    %c0_i32 = arith.constant 0 : i32
    %c0_i32_0 = arith.constant 0 : i32
    %c0_i32_1 = arith.constant 0 : i32
    return %c0_i32, %c0_i32_0 : i32, i32
  }
  func.func @transform_5(%arg0: i32) -> (i32, i32) {
    %c0_i32 = arith.constant 0 : i32
    %c0_i32_0 = arith.constant 0 : i32
    %c0_i32_1 = arith.constant 0 : i32
    return %c0_i32, %c0_i32_0 : i32, i32
  }
}

module attributes {stable_mosaic.version = 11 : i64} {
  func.func @_matmul_kernel(%arg0: i32, %arg1: memref<512x8xf32, #tpu.memory_space<vmem>>, %arg2: memref<8x128xf32, #tpu.memory_space<vmem>>, %arg3: memref<512x128xf32, #tpu.memory_space<vmem>>) attributes {dimension_semantics = [#tpu.dimension_semantics<parallel>], iteration_bounds = array<i64: 2>, scalar_prefetch = 0 : i64, scratch_operands = 0 : i64, tpu.core_type = #tpu.core_type<tc>, window_params = [{transform_indices = @transform_0, window_bounds = array<i64: 512, 8>}, {pipeline_mode = #tpu.pipeline_mode<synchronous>, transform_indices = @transform_1, window_bounds = array<i64: 8, 128>}, {transform_indices = @transform_2, window_bounds = array<i64: 512, 128>}]} {
    %c0 = arith.constant 0 : index
    %c0_0 = arith.constant 0 : index
    %0 = vector.load %arg1[%c0, %c0_0] : memref<512x8xf32, #tpu.memory_space<vmem>>, vector<512x8xf32>
    %c0_1 = arith.constant 0 : index
    %c0_2 = arith.constant 0 : index
    %1 = vector.load %arg2[%c0_1, %c0_2] : memref<8x128xf32, #tpu.memory_space<vmem>>, vector<8x128xf32>
    %cst = arith.constant dense<0.000000e+00> : vector<512x128xf32>
    %2 = tpu.matmul %0, %1, %cst {dimension_numbers = #tpu.dot_dimension_numbers<[1], [0], [0], [1], [0, 0, 1, 1], [], []>} : vector<512x8xf32>, vector<8x128xf32>, vector<512x128xf32> -> vector<512x128xf32>
    %c0_3 = arith.constant 0 : index
    %c0_4 = arith.constant 0 : index
    %3 = vector.load %arg3[%c0_3, %c0_4] : memref<512x128xf32, #tpu.memory_space<vmem>>, vector<512x128xf32>
    tpu.vector_store %arg3[%c0_3, %c0_4], %2 {strides = array<i32>} : memref<512x128xf32, #tpu.memory_space<vmem>>, vector<512x128xf32>,
    return
  }
  func.func @transform_0(%arg0: i32) -> (i32, i32) {
    %c0_i32 = arith.constant 0 : i32
    %c0_i32_0 = arith.constant 0 : i32
    return %arg0, %c0_i32 : i32, i32
  }
  func.func @transform_1(%arg0: i32) -> (i32, i32) {
    %c0_i32 = arith.constant 0 : i32
    %c0_i32_0 = arith.constant 0 : i32
    %c0_i32_1 = arith.constant 0 : i32
    return %c0_i32, %c0_i32_0 : i32, i32
  }
  func.func @transform_2(%arg0: i32) -> (i32, i32) {
    %c0_i32 = arith.constant 0 : i32
    %c0_i32_0 = arith.constant 0 : i32
    return %arg0, %c0_i32 : i32, i32
  }
}

module attributes {stable_mosaic.version = 11 : i64} {
  func.func @_matmul_kernel(%arg0: i32, %arg1: memref<512x4xf32, #tpu.memory_space<vmem>>, %arg2: memref<4x128xf32, #tpu.memory_space<vmem>>, %arg3: memref<512x128xf32, #tpu.memory_space<vmem>>) attributes {dimension_semantics = [#tpu.dimension_semantics<parallel>], iteration_bounds = array<i64: 16>, scalar_prefetch = 0 : i64, scratch_operands = 0 : i64, tpu.core_type = #tpu.core_type<tc>, window_params = [{transform_indices = @transform_0, window_bounds = array<i64: 512, 4>}, {pipeline_mode = #tpu.pipeline_mode<synchronous>, transform_indices = @transform_1, window_bounds = array<i64: 4, 128>}, {transform_indices = @transform_2, window_bounds = array<i64: 512, 128>}]} {
    %c0 = arith.constant 0 : index
    %c0_0 = arith.constant 0 : index
    %0 = vector.load %arg1[%c0, %c0_0] : memref<512x4xf32, #tpu.memory_space<vmem>>, vector<512x4xf32>
    %c0_1 = arith.constant 0 : index
    %c0_2 = arith.constant 0 : index
    %1 = vector.load %arg2[%c0_1, %c0_2] : memref<4x128xf32, #tpu.memory_space<vmem>>, vector<4x128xf32>
    %cst = arith.constant dense<0.000000e+00> : vector<512x128xf32>
    %2 = tpu.matmul %0, %1, %cst {dimension_numbers = #tpu.dot_dimension_numbers<[1], [0], [0], [1], [0, 0, 1, 1], [], []>} : vector<512x4xf32>, vector<4x128xf32>, vector<512x128xf32> -> vector<512x128xf32>
    %c0_3 = arith.constant 0 : index
    %c0_4 = arith.constant 0 : index
    %3 = vector.load %arg3[%c0_3, %c0_4] : memref<512x128xf32, #tpu.memory_space<vmem>>, vector<512x128xf32>
    tpu.vector_store %arg3[%c0_3, %c0_4], %2 {strides = array<i32>} : memref<512x128xf32, #tpu.memory_space<vmem>>, vector<512x128xf32>,
    return
  }
  func.func @transform_0(%arg0: i32) -> (i32, i32) {
    %c0_i32 = arith.constant 0 : i32
    %c0_i32_0 = arith.constant 0 : i32
    return %arg0, %c0_i32 : i32, i32
  }
  func.func @transform_1(%arg0: i32) -> (i32, i32) {
    %c0_i32 = arith.constant 0 : i32
    %c0_i32_0 = arith.constant 0 : i32
    %c0_i32_1 = arith.constant 0 : i32
    return %c0_i32, %c0_i32_0 : i32, i32
  }
  func.func @transform_2(%arg0: i32) -> (i32, i32) {
    %c0_i32 = arith.constant 0 : i32
    %c0_i32_0 = arith.constant 0 : i32
    return %arg0, %c0_i32 : i32, i32
  }
}

</mosaic_0001>

<bundles_post_ra>
// kernel: forward.4
= control target key start
LH: loop header
LB: loop body
LE: loop exit
PB: predicated region body
PF: predicated region fallthrough
CT: control target
= control target key end

     0   :  { %10 = vsyncpa [#allocation3], 0  ;;  %s572_s0 = inlined_call_operand.hbm [shape: f32[2,16], index: 0, kind: input, shape index: {}]   ;;  %s573_s1 = inlined_call_operand.hbm [shape: f32[16,32], index: 1, kind: input, shape index: {}]   ;;  %s574_s2 = inlined_call_operand.hbm [shape: f32[1,32], index: 2, kind: input, shape index: {}]   ;;  %s575_s3 = inlined_call_operand.hbm [shape: f32[32,512], index: 3, kind: input, shape index: {}]   ;;  %s576_s4 = inlined_call_operand.hbm [shape: f32[1,512], index: 4, kind: input, shape index: {}]   ;;  %s577_s5 = inlined_call_operand.vmem [shape: f32[2,512], index: 5, kind: output, shape index: {}]  }
   0x1   :  { %11 = vsyncpa [#allocation5], 0 }
   0x2   :  { %12 = vsyncpa [#allocation8], 0  ;;  %s512_s18 = smov [#allocation4]  }
   0x3   :  { %s28_s19 = sshll.u32 %s512_s18, 4  ;;  %s29_s19 = int_to_ptr.vmem [resolvable:$true] %s28_s19 }
   0x4   :  { %s414_s20 = scalar_lea.vmem %s29_s19, 256  ;;  %p419_p1 = scmp.lt.s32.totalorder %s29_s19, %s29_s19 }
   0x5   :  { %p415_p0 = scmp.ne.s32.totalorder %s29_s19, %s414_s20  ;;  %p420_p2 = scmp.lt.s32.totalorder %s414_s20, %s414_s20 }
   0x7   :  { %p421_p3 = por %p420_p2, %p419_p1 }
   0x9   :  { %p422_p4 = pnand %p421_p3, %p415_p0 }
   0xb   :  { %425 = shalt.err (!%p422_p4)
}
   0xc   :  { %s513_s21 = smov 128   ;;  %s514_s22 = smov 8  }
   0xd   :  { %34 = dma.hbm_to_vmem [thread:$0]  %s573_s1, 256, %s29_s19, [#allocation5], %s513_s21, %s513_s21, %s514_s22  }
   0xe   :  { %s515_s25 = smov [#allocation7]  }
   0xf   :  { %s50_s26 = sshll.u32 %s515_s25, 4  ;;  %s51_s26 = int_to_ptr.vmem [resolvable:$true] %s50_s26 }
  0x10   :  { %s434_s27 = scalar_lea.vmem %s51_s26, 2048  ;;  %p439_p6 = scmp.lt.s32.totalorder %s51_s26, %s51_s26 }
  0x11   :  { %p435_p5 = scmp.ne.s32.totalorder %s51_s26, %s434_s27  ;;  %p440_p7 = scmp.lt.s32.totalorder %s434_s27, %s434_s27 }
  0x13   :  { %p441_p8 = por %p440_p7, %p439_p6 }
  0x15   :  { %p442_p9 = pnand %p441_p8, %p435_p5 }
  0x17   :  { %445 = shalt.err (!%p442_p9)
}
  0x18   :  { %s516_s28 = smov 512   ;;  %s517_s29 = smov 32  }
  0x19   :  { %56 = dma.hbm_to_vmem [thread:$0]  %s575_s3, 2048, %s51_s26, [#allocation8], %s516_s28, %s516_s28, %s517_s29  }
  0x1a   :  { %s518_s7 = smov [#allocation2]   ;;  %s519_s9 = smov [#allocation6]  }
  0x1b   :  { %s19_s8 = sshll.u32 %s518_s7, 4  ;;  %s41_s1 = sshll.u32 %s519_s9, 4  ;;  %s20_s8 = int_to_ptr.vmem [resolvable:$true] %s19_s8  ;;  %s42_s1 = int_to_ptr.vmem [resolvable:$true] %s41_s1 }
  0x1c   :  { %s454_s10 = scalar_lea.vmem %s20_s8, 32  ;;  %p459_p11 = scmp.lt.s32.totalorder %s20_s8, %s20_s8 }
  0x1d   :  { %p455_p10 = scmp.ne.s32.totalorder %s20_s8, %s454_s10  ;;  %p460_p12 = scmp.lt.s32.totalorder %s454_s10, %s454_s10 }
  0x1f   :  { %p461_p13 = por %p460_p12, %p459_p11 }
  0x21   :  { %p462_p0 = pnand %p461_p13, %p455_p10 }
  0x23   :  { %465 = shalt.err (!%p462_p0)
}
  0x24   :  { %22 = dma.hbm_to_vmem [thread:$0]  %s572_s0, 32, %s20_s8, [#allocation3]  }
  0x25   :  { %s474_s13 = scalar_lea.vmem %s42_s1, 16  ;;  %s478_s3 = scalar_lea.vmem %s42_s1, 32 }
  0x26   :  { %p475_p1 = scmp.ne.s32.totalorder %s42_s1, %s474_s13  ;;  %p479_p2 = scmp.lt.s32.totalorder %s42_s1, %s42_s1 }
  0x27   :  { %p480_p3 = scmp.lt.s32.totalorder %s478_s3, %s474_s13 }
  0x29   :  { %p481_p4 = por %p480_p3, %p479_p2 }
  0x2b   :  { %p482_p5 = pnand %p481_p4, %p475_p1 }
  0x2d   :  { %485 = shalt.err (!%p482_p5)
}
  0x2e   :  { %44 = dma.hbm_to_vmem [thread:$0]  %s574_s2, 16, %s42_s1, [#allocation5]  }
  0x2f   :  { %s520_s16 = smov [#allocation9]  }
  0x30   :  { %s63_s17 = sshll.u32 %s520_s16, 4  ;;  %s64_s17 = int_to_ptr.vmem [resolvable:$true] %s63_s17 }
  0x31   :  { %s494_s18 = scalar_lea.vmem %s64_s17, 64  ;;  %p499_p7 = scmp.lt.s32.totalorder %s64_s17, %s64_s17 }
  0x32   :  { %p495_p6 = scmp.ne.s32.totalorder %s64_s17, %s494_s18  ;;  %p500_p8 = scmp.lt.s32.totalorder %s494_s18, %s494_s18 }
  0x34   :  { %p501_p9 = por %p500_p8, %p499_p7 }
  0x36   :  { %p502_p10 = pnand %p501_p9, %p495_p6 }
  0x38   :  { %505 = shalt.err (!%p502_p10)
}
  0x39   :  { %66 = dma.hbm_to_vmem [thread:$0]  %s576_s4, 64, %s64_s17, [#allocation8]  }
  0x3a   :  { %506 = dma.done.wait [#allocation3], 32  }
  0x3b   :  { %507 = vsyncadd [#allocation3], 4294967264 }
  0x3c   :  { %508 = dma.done.wait [#allocation5], 272  }
  0x3d   :  { %509 = vsyncadd [#allocation5], 4294967024 }
  0x3e   :  { %510 = dma.done.wait [#allocation8], 2112  }
  0x3f   :  { %511 = vsyncadd [#allocation8], 4294965184  ;;  %v521_v0 = vmov 0.0   ;;  %vm522_vm0 = vmmov 0   ;;  %v84_v1 = vld [vmem:[#allocation4 + $0x8] sm:$0xff]  ;;  %v83_v2 = vld [vmem:[#allocation4] sm:$0xff]  ;;  %v184_v24 = vlaneseq }
  0x40   :  { %387 = vmatprep.subr.mxu0 %v521_v0  ;;  %391 = vmatprep.mubr.msk.f32.mxu0 %vm522_vm0, %v521_v0  ;;  %v82_v3 = vld [vmem:[#allocation2] sm:$0x3]  ;;  %vm92_vm1 = vcmask 130048   ;;  %v181_v5 = vld [vmem:[#allocation7 + $0x78] sm:$0xff]  ;;  %v178_v6 = vld [vmem:[#allocation7 + $0x60] sm:$0xff]  ;;  %vm204_vm2 = vcmask 261120  }
  0x41   :  { %272 = vmatprep.mubr.f32.mxu1 %v521_v0  ;;  %388 = vmatpush3.msra.mxu0 %v84_v1  ;;  %v179_v4 = vld [vmem:[#allocation7 + $0x68] sm:$0xff]  ;;  %v180_v7 = vld [vmem:[#allocation7 + $0x70] sm:$0xff]  ;;  %v177_v9 = vld [vmem:[#allocation7 + $0x58] sm:$0xff]  ;;  %v185_v25 = vshrl.u32 %v184_v24, 7  ;;  %v523_v26 = vmov 1983009808  }
  0x42   :  { %389 = vmatprep.subr.mxu0 %v521_v0  ;;  %232 = vmatprep.subr.mxu1 %v179_v4  ;;  %v175_v8 = vld [vmem:[#allocation7 + $0x48] sm:$0xff]  ;;  %v174_v10 = vld [vmem:[#allocation7 + $0x40] sm:$0xff]  ;;  %v176_v11 = vld [vmem:[#allocation7 + $0x50] sm:$0xff]  ;;  %v357_v27 = vunpack.c.l.s4 %v523_v26 }
  0x43   :  { %390 = vmatpush3.msra.mxu0 %v83_v2  ;;  %233 = vmatpush1.msra.mxu1 %v178_v6  ;;  %v171_v12 = vld [vmem:[#allocation7 + $0x28] sm:$0xff]  ;;  %v173_v13 = vld [vmem:[#allocation7 + $0x38] sm:$0xff]  ;;  %v170_v14 = vld [vmem:[#allocation7 + $0x20] sm:$0xff]  ;;  %v186_v28 = vsub.s32 0, %v185_v25  ;;  %v194_v29 = vsub.s32 2, %v185_v25  ;;  %v190_v30 = vsub.s32 1, %v185_v25 }
  0x44   :  { %392 = vmatmul.mubr.msk.f32.vlgmr.msra.gmra.mxu0 %vm92_vm1, %v82_v3  ;;  %303 = vmatprep.subr.mxu0 %v181_v5  ;;  %v172_v15 = vld [vmem:[#allocation7 + $0x30] sm:$0xff]  ;;  %v167_v16 = vld [vmem:[#allocation7 + $0x8] sm:$0xff]  ;;  %v169_v17 = vld [vmem:[#allocation7 + $0x18] sm:$0xff]  ;;  %v198_v31 = vsub.s32 3, %v185_v25  ;;  %v358_v33 = vunpack.c.0.s8 %v357_v27 }
  0x45   :  { %304 = vmatpush1.msra.mxu0 %v180_v7  ;;  %234 = vmatprep.subr.mxu1 %v175_v8  ;;  %v166_v18 = vld [vmem:[#allocation7] sm:$0xff]  ;;  %v168_v19 = vld [vmem:[#allocation7 + $0x10] sm:$0xff]  ;;  %v380_v20 = vld [vmem:[#allocation6] ss:$0 sm:$0xff] }
  0x46   :  { %305 = vmatprep.subr.mxu0 %v177_v9  ;;  %235 = vmatpush1.msra.mxu1 %v174_v10  ;;  %v182_v32 = vld [vmem:[#allocation9] sm:$0xf]  ;;  %v361_v41 = vsub.s32 %v358_v33, %v185_v25 }
  0x47   :  { %306 = vmatpush1.msra.mxu0 %v176_v11  ;;  %236 = vmatprep.subr.mxu1 %v171_v12  ;;  %v187_v34 = vrot.slane %v182_v32, %v186_v28  ;;  %v195_v35 = vrot.slane %v182_v32, %v194_v29  ;;  %v191_v36 = vrot.slane %v182_v32, %v190_v30 }
  0x48   :  { %307 = vmatprep.subr.mxu0 %v173_v13  ;;  %343 = vmatprep.mubr.f32.mxu0 %v521_v0  ;;  %v199_v37 = vrot.slane %v182_v32, %v198_v31 }
  0x49   :  { %237 = vmatpush1.msra.mxu1 %v170_v14  ;;  %308 = vmatpush1.msra.mxu0 %v172_v15 }
  0x4a   :  { %238 = vmatprep.subr.mxu1 %v167_v16  ;;  %309 = vmatprep.subr.mxu0 %v169_v17 }
  0x4b   :  { %239 = vmatpush1.msra.mxu1 %v166_v18  ;;  %310 = vmatpush1.msra.mxu0 %v168_v19 }
 0x104   :  { %v162_v21 = vpop.f32.mrf.mxu0 }
 0x105   :  { %v163_v22 = vadd.f32 %v380_v20, %v162_v21 }
 0x106   :  { %v393_v23 = vpop.f32.mrf.mxu0 }
 0x107   :  { %382 = vmatmul.mubr.msk.f32.vlgmr.msra.gmra.mxu1 %vm204_vm2, %v163_v22  ;;  %383 = vmatmul.mubr.msk.f32.vlgmr.msra.gmra.mxu0 %vm204_vm2, %v163_v22 }
 0x1c7   :  { %v274_v38 = vpop.f32.mrf.mxu1  ;;  %v345_v39 = vpop.f32.mrf.mxu0 }
 0x1c8   :  { %v275_v43 = vadd.f32 %v274_v38, %v187_v34  ;;  %v346_v44 = vadd.f32 %v345_v39, %v195_v35 }
 0x1c9   :  { %v276_v40 = vpop.f32.mrf.mxu1  ;;  %v347_v42 = vpop.f32.mrf.mxu0 }
 0x1ca   :  { %v277_v45 = vadd.f32 %v276_v40, %v191_v36  ;;  %v348_v46 = vadd.f32 %v347_v42, %v199_v37 }
 0x1cc   :  { %v354_v47 = vcombine.low %v275_v43, %v277_v45  ;;  %v355_v48 = vcombine.low %v346_v44, %v348_v46 }
 0x1ce   :  { %v362_v49 = vrot.slane %v354_v47, %v361_v41  ;;  %v369_v50 = vrot.slane %v355_v48, %v361_v41 }
 0x1d0   :  { %v370_v51 = vcombine.low %v362_v49, %v369_v50 }
 0x1d2   :  { %372 = vst [vmem:[%s577_s5] sm:$0xff] %v370_v51 }
 0x1d3   :  { %377 = vsyncpa [#allocation3], 1 }
 0x1d4   :  { %378 = vsyncpa [#allocation5], 1 }
 0x1d5   :  { %379 = vsyncpa [#allocation8], 1 }

// kernel: forward.5
= control target key start
LH: loop header
LB: loop body
LE: loop exit
PB: predicated region body
PF: predicated region fallthrough
CT: control target
= control target key end

     0   :  { %7 = vsyncpa [#allocation3], 0  ;;  %s330_s9 = smov [#allocation2]   ;;  %s510_s0 = inlined_call_operand.vmem [shape: f32[128,8], index: 0, kind: input, shape index: {}]   ;;  %s511_s1 = inlined_call_operand.hbm [shape: f32[8,256], index: 1, kind: input, shape index: {}]   ;;  %s512_s2 = inlined_call_operand.vmem [shape: f32[128,256], index: 2, kind: output, shape index: {}]  }
   0x1   :  { %s16_s10 = sshll.u32 %s330_s9, 4  ;;  %s17_s10 = int_to_ptr.vmem [resolvable:$true] %s16_s10 }
   0x2   :  { %s316_s11 = scalar_lea.vmem %s17_s10, 256  ;;  %p321_p1 = scmp.lt.s32.totalorder %s17_s10, %s17_s10 }
   0x3   :  { %p317_p0 = scmp.ne.s32.totalorder %s17_s10, %s316_s11  ;;  %p322_p2 = scmp.lt.s32.totalorder %s316_s11, %s316_s11 }
   0x5   :  { %p323_p3 = por %p322_p2, %p321_p1 }
   0x7   :  { %p324_p4 = pnand %p323_p3, %p317_p0 }
   0x9   :  { %327 = shalt.err (!%p324_p4)
}
   0xa   :  { %19 = dma.hbm_to_vmem [thread:$0]  %s511_s1, 256, %s17_s10, [#allocation3]  }
   0xb   :  { %328 = dma.done.wait [#allocation3], 256  }
   0xc   :  { %329 = vsyncadd [#allocation3], 4294967040  ;;  %v331_v0 = vmov 0.0   ;;  %v40_v1 = vld [vmem:[#allocation2 + $0x8] sm:$0xff]  ;;  %v39_v2 = vld [vmem:[#allocation2] sm:$0xff]  ;;  %vm41_vm0 = vcmask 64512  }
   0xd   :  { %154 = vmatprep.mubr.f32.mxu0 %v331_v0  ;;  %202 = vmatprep.mubr.f32.mxu1 %v331_v0  ;;  %v23_v3 = vld [vmem:[%s510_s0] sm:$0xff]  ;;  %v24_v5 = vld [vmem:[%s510_s0 + $0x8] sm:$0xff]  ;;  %v25_v7 = vld [vmem:[%s510_s0 + $0x10] sm:$0xff] }
   0xe   :  { %120 = vmatprep.subr.mxu0 %v40_v1  ;;  %304 = vmatprep.subr.mxu1 %v40_v1  ;;  %v31_v4 = vld [vmem:[%s510_s0 + $0x40] sm:$0xff]  ;;  %v32_v6 = vld [vmem:[%s510_s0 + $0x48] sm:$0xff]  ;;  %v33_v8 = vld [vmem:[%s510_s0 + $0x50] sm:$0xff] }
   0xf   :  { %121 = vmatpush1.msra.mxu0 %v39_v2  ;;  %305 = vmatpush1.msra.mxu1 %v39_v2  ;;  %v26_v9 = vld [vmem:[%s510_s0 + $0x18] sm:$0xff]  ;;  %v27_v11 = vld [vmem:[%s510_s0 + $0x20] sm:$0xff]  ;;  %v28_v13 = vld [vmem:[%s510_s0 + $0x28] sm:$0xff] }
  0x10   :  { %288 = vmatmul.mubr.msk.f32.vlgmr.msra.gmra.mxu0 %vm41_vm0, %v23_v3  ;;  %296 = vmatmul.mubr.msk.f32.vlgmr.msra.gmra.mxu1 %vm41_vm0, %v31_v4  ;;  %v34_v10 = vld [vmem:[%s510_s0 + $0x58] sm:$0xff]  ;;  %v35_v12 = vld [vmem:[%s510_s0 + $0x60] sm:$0xff]  ;;  %v36_v14 = vld [vmem:[%s510_s0 + $0x68] sm:$0xff] }
  0x11   :  { %160 = vmatprep.mubr.f32.mxu0 %v331_v0  ;;  %208 = vmatprep.mubr.f32.mxu1 %v331_v0  ;;  %v29_v15 = vld [vmem:[%s510_s0 + $0x30] sm:$0xff]  ;;  %v30_v17 = vld [vmem:[%s510_s0 + $0x38] sm:$0xff] }
  0x12   :  { %v37_v16 = vld [vmem:[%s510_s0 + $0x70] sm:$0xff]  ;;  %v38_v18 = vld [vmem:[%s510_s0 + $0x78] sm:$0xff] }
  0x14   :  { %289 = vmatmul.mubr.msk.f32.gmra.mxu0 %vm41_vm0, %v24_v5  ;;  %297 = vmatmul.mubr.msk.f32.gmra.mxu1 %vm41_vm0, %v32_v6 }
  0x15   :  { %166 = vmatprep.mubr.f32.mxu0 %v331_v0  ;;  %214 = vmatprep.mubr.f32.mxu1 %v331_v0 }
  0x18   :  { %290 = vmatmul.mubr.msk.f32.gmra.mxu0 %vm41_vm0, %v25_v7  ;;  %298 = vmatmul.mubr.msk.f32.gmra.mxu1 %vm41_vm0, %v33_v8 }
  0x19   :  { %172 = vmatprep.mubr.f32.mxu0 %v331_v0  ;;  %220 = vmatprep.mubr.f32.mxu1 %v331_v0 }
  0x1c   :  { %291 = vmatmul.mubr.msk.f32.gmra.mxu0 %vm41_vm0, %v26_v9  ;;  %299 = vmatmul.mubr.msk.f32.gmra.mxu1 %vm41_vm0, %v34_v10 }
  0x1d   :  { %178 = vmatprep.mubr.f32.mxu0 %v331_v0  ;;  %226 = vmatprep.mubr.f32.mxu1 %v331_v0 }
  0x20   :  { %292 = vmatmul.mubr.msk.f32.gmra.mxu0 %vm41_vm0, %v27_v11  ;;  %300 = vmatmul.mubr.msk.f32.gmra.mxu1 %vm41_vm0, %v35_v12 }
  0x21   :  { %184 = vmatprep.mubr.f32.mxu0 %v331_v0  ;;  %232 = vmatprep.mubr.f32.mxu1 %v331_v0 }
  0x24   :  { %293 = vmatmul.mubr.msk.f32.gmra.mxu0 %vm41_vm0, %v28_v13  ;;  %301 = vmatmul.mubr.msk.f32.gmra.mxu1 %vm41_vm0, %v36_v14 }
  0x25   :  { %190 = vmatprep.mubr.f32.mxu0 %v331_v0  ;;  %238 = vmatprep.mubr.f32.mxu1 %v331_v0 }
  0x28   :  { %294 = vmatmul.mubr.msk.f32.gmra.mxu0 %vm41_vm0, %v29_v15  ;;  %302 = vmatmul.mubr.msk.f32.gmra.mxu1 %vm41_vm0, %v37_v16 }
  0x29   :  { %196 = vmatprep.mubr.f32.mxu0 %v331_v0  ;;  %244 = vmatprep.mubr.f32.mxu1 %v331_v0 }
  0x2c   :  { %295 = vmatmul.mubr.msk.f32.gmra.mxu0 %vm41_vm0, %v30_v17  ;;  %303 = vmatmul.mubr.msk.f32.gmra.mxu1 %vm41_vm0, %v38_v18 }
  0xd0   :  { %v156_v19 = vpop.f32.mrf.mxu0  ;;  %v204_v20 = vpop.f32.mrf.mxu1 }
  0xd1   :  { %251 = vst [vmem:[%s512_s2] sm:$0xff] %v156_v19  ;;  %267 = vst [vmem:[%s512_s2 + $0x80] sm:$0xff] %v204_v20 }
  0xd2   :  { %v158_v21 = vpop.f32.mrf.mxu0  ;;  %v206_v22 = vpop.f32.mrf.mxu1 }
  0xd3   :  { %252 = vst [vmem:[%s512_s2 + $0x8] sm:$0xff] %v158_v21  ;;  %268 = vst [vmem:[%s512_s2 + $0x88] sm:$0xff] %v206_v22 }
  0xd4   :  { %v162_v23 = vpop.f32.mrf.mxu0  ;;  %v210_v24 = vpop.f32.mrf.mxu1 }
  0xd5   :  { %253 = vst [vmem:[%s512_s2 + $0x10] sm:$0xff] %v162_v23  ;;  %269 = vst [vmem:[%s512_s2 + $0x90] sm:$0xff] %v210_v24 }
  0xd6   :  { %v164_v25 = vpop.f32.mrf.mxu0  ;;  %v212_v26 = vpop.f32.mrf.mxu1 }
  0xd7   :  { %254 = vst [vmem:[%s512_s2 + $0x18] sm:$0xff] %v164_v25  ;;  %270 = vst [vmem:[%s512_s2 + $0x98] sm:$0xff] %v212_v26 }
  0xd8   :  { %v168_v27 = vpop.f32.mrf.mxu0  ;;  %v216_v28 = vpop.f32.mrf.mxu1 }
  0xd9   :  { %255 = vst [vmem:[%s512_s2 + $0x20] sm:$0xff] %v168_v27  ;;  %271 = vst [vmem:[%s512_s2 + $0xa0] sm:$0xff] %v216_v28 }
  0xda   :  { %v170_v29 = vpop.f32.mrf.mxu0  ;;  %v218_v30 = vpop.f32.mrf.mxu1 }
  0xdb   :  { %256 = vst [vmem:[%s512_s2 + $0x28] sm:$0xff] %v170_v29  ;;  %272 = vst [vmem:[%s512_s2 + $0xa8] sm:$0xff] %v218_v30 }
  0xdc   :  { %v174_v31 = vpop.f32.mrf.mxu0  ;;  %v222_v32 = vpop.f32.mrf.mxu1 }
  0xdd   :  { %257 = vst [vmem:[%s512_s2 + $0x30] sm:$0xff] %v174_v31  ;;  %273 = vst [vmem:[%s512_s2 + $0xb0] sm:$0xff] %v222_v32 }
  0xde   :  { %v176_v33 = vpop.f32.mrf.mxu0  ;;  %v224_v34 = vpop.f32.mrf.mxu1 }
  0xdf   :  { %258 = vst [vmem:[%s512_s2 + $0x38] sm:$0xff] %v176_v33  ;;  %274 = vst [vmem:[%s512_s2 + $0xb8] sm:$0xff] %v224_v34 }
  0xe0   :  { %v180_v35 = vpop.f32.mrf.mxu0  ;;  %v228_v36 = vpop.f32.mrf.mxu1 }
  0xe1   :  { %259 = vst [vmem:[%s512_s2 + $0x40] sm:$0xff] %v180_v35  ;;  %275 = vst [vmem:[%s512_s2 + $0xc0] sm:$0xff] %v228_v36 }
  0xe2   :  { %v182_v37 = vpop.f32.mrf.mxu0  ;;  %v230_v38 = vpop.f32.mrf.mxu1 }
  0xe3   :  { %260 = vst [vmem:[%s512_s2 + $0x48] sm:$0xff] %v182_v37  ;;  %276 = vst [vmem:[%s512_s2 + $0xc8] sm:$0xff] %v230_v38 }
  0xe4   :  { %v186_v39 = vpop.f32.mrf.mxu0  ;;  %v234_v40 = vpop.f32.mrf.mxu1 }
  0xe5   :  { %261 = vst [vmem:[%s512_s2 + $0x50] sm:$0xff] %v186_v39  ;;  %277 = vst [vmem:[%s512_s2 + $0xd0] sm:$0xff] %v234_v40 }
  0xe6   :  { %v188_v41 = vpop.f32.mrf.mxu0  ;;  %v236_v42 = vpop.f32.mrf.mxu1 }
  0xe7   :  { %262 = vst [vmem:[%s512_s2 + $0x58] sm:$0xff] %v188_v41  ;;  %278 = vst [vmem:[%s512_s2 + $0xd8] sm:$0xff] %v236_v42 }
  0xe8   :  { %v192_v43 = vpop.f32.mrf.mxu0  ;;  %v240_v44 = vpop.f32.mrf.mxu1 }
  0xe9   :  { %263 = vst [vmem:[%s512_s2 + $0x60] sm:$0xff] %v192_v43  ;;  %279 = vst [vmem:[%s512_s2 + $0xe0] sm:$0xff] %v240_v44 }
  0xea   :  { %v194_v45 = vpop.f32.mrf.mxu0  ;;  %v242_v46 = vpop.f32.mrf.mxu1 }
  0xeb   :  { %264 = vst [vmem:[%s512_s2 + $0x68] sm:$0xff] %v194_v45  ;;  %280 = vst [vmem:[%s512_s2 + $0xe8] sm:$0xff] %v242_v46 }
  0xec   :  { %v198_v47 = vpop.f32.mrf.mxu0  ;;  %v246_v48 = vpop.f32.mrf.mxu1 }
  0xed   :  { %265 = vst [vmem:[%s512_s2 + $0x70] sm:$0xff] %v198_v47  ;;  %281 = vst [vmem:[%s512_s2 + $0xf0] sm:$0xff] %v246_v48 }
  0xee   :  { %v200_v49 = vpop.f32.mrf.mxu0  ;;  %v248_v50 = vpop.f32.mrf.mxu1 }
  0xef   :  { %266 = vst [vmem:[%s512_s2 + $0x78] sm:$0xff] %v200_v49  ;;  %282 = vst [vmem:[%s512_s2 + $0xf8] sm:$0xff] %v248_v50 }
  0xf0   :  { %287 = vsyncpa [#allocation3], 1 }

// kernel: forward.6
= control target key start
LH: loop header
LB: loop body
LE: loop exit
PB: predicated region body
PF: predicated region fallthrough
CT: control target
= control target key end

     0   :  { %s1181_s9 = smov 0   ;;  %s1404_s0 = inlined_call_operand.vmem [shape: f32[1024,8], index: 0, kind: input, shape index: {}]   ;;  %s1405_s1 = inlined_call_operand.vmem [shape: f32[8,128], index: 1, kind: input, shape index: {}]   ;;  %s1406_s2 = inlined_call_operand.vmem [shape: f32[1024,128], index: 2, kind: output, shape index: {}]  }
   0x1 LB: > { %s910_s10 = sadd.s32 4294967295, %s1164_s9   ;;  %p914_p0 = scmp.ge.s32.totalorder %s1164_s9, 1  ;;  %s1164_s9 = sphi %s1181_s9, %s12_s9  }
   0x2   : > { %p113_p1 = scmp.lt.s32.totalorder %s1164_s9, 3 }
   0x4   : > { %p114_p2 = pnand %p914_p0, %p113_p1 }
   0x5   : > { %s915_s13 = sshll.u32 (!%p114_p2), %s910_s10, 6 }
   0x6   : > { %117 = sbr.rel (%p114_p2) target bundleno = 273 (0x111), region = 28  ;;  %p136_p3 = scmp.lt.s32.totalorder (!%p114_p2), %s915_s13, 127 }
   0xb   : > { %v211_v0 = vld [vmem:[%s1405_s1] sm:$0xff]  ;;  %s1408_s13 = smov (!%p136_p3, %s915_s13), 127  ;;  %vm212_vm0 = vcmask 64512  }
   0xc   : > { %1050 = vmatprep.subr.mxu0 %v211_v0  ;;  %1148 = vmatprep.subr.mxu1 %v211_v0  ;;  %s916_s14 = sshll.u32 %s1408_s13, 3 }
   0xd   : > { %1051 = vmatpush3.msra.mxu0 %v211_v0  ;;  %1149 = vmatpush3.msra.mxu1 %v211_v0  ;;  %s1200_s17 = scalar_lea.vmem %s1404_s0, %s916_s14  ;;  %s1335_s20 = scalar_lea.vmem %s1406_s2, %s916_s14 }
   0xe   : > { %v147_v1 = vld [vmem:[%s1200_s17] sm:$0xff]  ;;  %v148_v3 = vld [vmem:[%s1200_s17 + $0x8] sm:$0xff]  ;;  %v149_v5 = vld [vmem:[%s1200_s17 + $0x10] sm:$0xff] }
   0xf   : > { %v179_v2 = vld [vmem:[%s1200_s17 + $0x100] sm:$0xff]  ;;  %1052 = vmatprep.mubr.msk.f32.mxu0 %vm212_vm0, %v147_v1  ;;  %v180_v4 = vld [vmem:[%s1200_s17 + $0x108] sm:$0xff]  ;;  %v181_v6 = vld [vmem:[%s1200_s17 + $0x110] sm:$0xff] }
  0x10   : > { %1100 = vmatprep.mubr.msk.f32.mxu1 %vm212_vm0, %v179_v2  ;;  %1053 = vmatmul.mubr.msk.f32.vlgmr.msra.gmra.mxu0 %vm212_vm0, %v148_v3  ;;  %v150_v7 = vld [vmem:[%s1200_s17 + $0x18] sm:$0xff]  ;;  %v151_v9 = vld [vmem:[%s1200_s17 + $0x20] sm:$0xff]  ;;  %v152_v11 = vld [vmem:[%s1200_s17 + $0x28] sm:$0xff] }
  0x11   : > { %1101 = vmatmul.mubr.msk.f32.vlgmr.msra.gmra.mxu1 %vm212_vm0, %v180_v4  ;;  %1055 = vmatprep.mubr.msk.f32.mxu0 %vm212_vm0, %v149_v5  ;;  %v182_v8 = vld [vmem:[%s1200_s17 + $0x118] sm:$0xff]  ;;  %v183_v10 = vld [vmem:[%s1200_s17 + $0x120] sm:$0xff]  ;;  %v184_v12 = vld [vmem:[%s1200_s17 + $0x128] sm:$0xff] }
  0x12   : > { %1103 = vmatprep.mubr.msk.f32.mxu1 %vm212_vm0, %v181_v6  ;;  %v153_v13 = vld [vmem:[%s1200_s17 + $0x30] sm:$0xff]  ;;  %v154_v15 = vld [vmem:[%s1200_s17 + $0x38] sm:$0xff]  ;;  %v155_v17 = vld [vmem:[%s1200_s17 + $0x40] sm:$0xff] }
  0x13   : > { %v185_v14 = vld [vmem:[%s1200_s17 + $0x130] sm:$0xff]  ;;  %v186_v16 = vld [vmem:[%s1200_s17 + $0x138] sm:$0xff]  ;;  %v187_v18 = vld [vmem:[%s1200_s17 + $0x140] sm:$0xff] }
  0x14   : > { %1056 = vmatmul.mubr.msk.f32.gmra.mxu0 %vm212_vm0, %v150_v7  ;;  %v156_v19 = vld [vmem:[%s1200_s17 + $0x48] sm:$0xff]  ;;  %v157_v21 = vld [vmem:[%s1200_s17 + $0x50] sm:$0xff]  ;;  %v158_v23 = vld [vmem:[%s1200_s17 + $0x58] sm:$0xff] }
  0x15   : > { %1104 = vmatmul.mubr.msk.f32.gmra.mxu1 %vm212_vm0, %v182_v8  ;;  %1058 = vmatprep.mubr.msk.f32.mxu0 %vm212_vm0, %v151_v9  ;;  %v188_v20 = vld [vmem:[%s1200_s17 + $0x148] sm:$0xff]  ;;  %v189_v22 = vld [vmem:[%s1200_s17 + $0x150] sm:$0xff]  ;;  %v190_v24 = vld [vmem:[%s1200_s17 + $0x158] sm:$0xff] }
  0x16   : > { %1106 = vmatprep.mubr.msk.f32.mxu1 %vm212_vm0, %v183_v10  ;;  %v159_v25 = vld [vmem:[%s1200_s17 + $0x60] sm:$0xff]  ;;  %v160_v27 = vld [vmem:[%s1200_s17 + $0x68] sm:$0xff]  ;;  %v161_v29 = vld [vmem:[%s1200_s17 + $0x70] sm:$0xff] }
  0x17   : > { %v191_v26 = vld [vmem:[%s1200_s17 + $0x160] sm:$0xff]  ;;  %v192_v28 = vld [vmem:[%s1200_s17 + $0x168] sm:$0xff]  ;;  %v193_v30 = vld [vmem:[%s1200_s17 + $0x170] sm:$0xff] }
  0x18   : > { %1059 = vmatmul.mubr.msk.f32.gmra.mxu0 %vm212_vm0, %v152_v11  ;;  %v162_v31 = vld [vmem:[%s1200_s17 + $0x78] sm:$0xff]  ;;  %v163_v33 = vld [vmem:[%s1200_s17 + $0x80] sm:$0xff]  ;;  %v164_v35 = vld [vmem:[%s1200_s17 + $0x88] sm:$0xff] }
  0x19   : > { %1107 = vmatmul.mubr.msk.f32.gmra.mxu1 %vm212_vm0, %v184_v12  ;;  %1061 = vmatprep.mubr.msk.f32.mxu0 %vm212_vm0, %v153_v13  ;;  %v194_v32 = vld [vmem:[%s1200_s17 + $0x178] sm:$0xff]  ;;  %v195_v34 = vld [vmem:[%s1200_s17 + $0x180] sm:$0xff]  ;;  %v196_v36 = vld [vmem:[%s1200_s17 + $0x188] sm:$0xff] }
  0x1a   : > { %1109 = vmatprep.mubr.msk.f32.mxu1 %vm212_vm0, %v185_v14  ;;  %v165_v37 = vld [vmem:[%s1200_s17 + $0x90] sm:$0xff]  ;;  %v166_v39 = vld [vmem:[%s1200_s17 + $0x98] sm:$0xff]  ;;  %v167_v41 = vld [vmem:[%s1200_s17 + $0xa0] sm:$0xff] }
  0x1b   : > { %v197_v38 = vld [vmem:[%s1200_s17 + $0x190] sm:$0xff]  ;;  %v198_v40 = vld [vmem:[%s1200_s17 + $0x198] sm:$0xff]  ;;  %v199_v42 = vld [vmem:[%s1200_s17 + $0x1a0] sm:$0xff] }
  0x1c   : > { %1062 = vmatmul.mubr.msk.f32.gmra.mxu0 %vm212_vm0, %v154_v15  ;;  %v168_v43 = vld [vmem:[%s1200_s17 + $0xa8] sm:$0xff]  ;;  %v169_v45 = vld [vmem:[%s1200_s17 + $0xb0] sm:$0xff]  ;;  %v170_v47 = vld [vmem:[%s1200_s17 + $0xb8] sm:$0xff] }
  0x1d   : > { %1110 = vmatmul.mubr.msk.f32.gmra.mxu1 %vm212_vm0, %v186_v16  ;;  %1064 = vmatprep.mubr.msk.f32.mxu0 %vm212_vm0, %v155_v17  ;;  %v200_v44 = vld [vmem:[%s1200_s17 + $0x1a8] sm:$0xff]  ;;  %v201_v46 = vld [vmem:[%s1200_s17 + $0x1b0] sm:$0xff]  ;;  %v202_v48 = vld [vmem:[%s1200_s17 + $0x1b8] sm:$0xff] }
  0x1e   : > { %1112 = vmatprep.mubr.msk.f32.mxu1 %vm212_vm0, %v187_v18  ;;  %v171_v49 = vld [vmem:[%s1200_s17 + $0xc0] sm:$0xff]  ;;  %v172_v51 = vld [vmem:[%s1200_s17 + $0xc8] sm:$0xff]  ;;  %v173_v53 = vld [vmem:[%s1200_s17 + $0xd0] sm:$0xff] }
  0x1f   : > { %v203_v50 = vld [vmem:[%s1200_s17 + $0x1c0] sm:$0xff]  ;;  %v204_v52 = vld [vmem:[%s1200_s17 + $0x1c8] sm:$0xff]  ;;  %v205_v54 = vld [vmem:[%s1200_s17 + $0x1d0] sm:$0xff] }
  0x20   : > { %1065 = vmatmul.mubr.msk.f32.gmra.mxu0 %vm212_vm0, %v156_v19  ;;  %v174_v55 = vld [vmem:[%s1200_s17 + $0xd8] sm:$0xff]  ;;  %v175_v57 = vld [vmem:[%s1200_s17 + $0xe0] sm:$0xff]  ;;  %v176_v59 = vld [vmem:[%s1200_s17 + $0xe8] sm:$0xff] }
  0x21   : > { %1113 = vmatmul.mubr.msk.f32.gmra.mxu1 %vm212_vm0, %v188_v20  ;;  %1067 = vmatprep.mubr.msk.f32.mxu0 %vm212_vm0, %v157_v21  ;;  %v206_v56 = vld [vmem:[%s1200_s17 + $0x1d8] sm:$0xff]  ;;  %v207_v58 = vld [vmem:[%s1200_s17 + $0x1e0] sm:$0xff]  ;;  %v208_v60 = vld [vmem:[%s1200_s17 + $0x1e8] sm:$0xff] }
  0x22   : > { %1115 = vmatprep.mubr.msk.f32.mxu1 %vm212_vm0, %v189_v22  ;;  %v177_v61 = vld [vmem:[%s1200_s17 + $0xf0] sm:$0xff]  ;;  %v178_v63 = vld [vmem:[%s1200_s17 + $0xf8] sm:$0xff] }
  0x23   : > { %v209_v62 = vld [vmem:[%s1200_s17 + $0x1f0] sm:$0xff]  ;;  %v210_v0 = vld [vmem:[%s1200_s17 + $0x1f8] sm:$0xff] }
  0x24   : > { %1068 = vmatmul.mubr.msk.f32.gmra.mxu0 %vm212_vm0, %v158_v23 }
  0x25   : > { %1116 = vmatmul.mubr.msk.f32.gmra.mxu1 %vm212_vm0, %v190_v24  ;;  %1070 = vmatprep.mubr.msk.f32.mxu0 %vm212_vm0, %v159_v25 }
  0x26   : > { %1118 = vmatprep.mubr.msk.f32.mxu1 %vm212_vm0, %v191_v26 }
  0x28   : > { %1071 = vmatmul.mubr.msk.f32.gmra.mxu0 %vm212_vm0, %v160_v27 }
  0x29   : > { %1119 = vmatmul.mubr.msk.f32.gmra.mxu1 %vm212_vm0, %v192_v28  ;;  %1073 = vmatprep.mubr.msk.f32.mxu0 %vm212_vm0, %v161_v29 }
  0x2a   : > { %1121 = vmatprep.mubr.msk.f32.mxu1 %vm212_vm0, %v193_v30 }
  0x2c   : > { %1074 = vmatmul.mubr.msk.f32.gmra.mxu0 %vm212_vm0, %v162_v31 }
  0x2d   : > { %1122 = vmatmul.mubr.msk.f32.gmra.mxu1 %vm212_vm0, %v194_v32  ;;  %1076 = vmatprep.mubr.msk.f32.mxu0 %vm212_vm0, %v163_v33 }
  0x2e   : > { %1124 = vmatprep.mubr.msk.f32.mxu1 %vm212_vm0, %v195_v34 }
  0x30   : > { %1077 = vmatmul.mubr.msk.f32.gmra.mxu0 %vm212_vm0, %v164_v35 }
  0x31   : > { %1125 = vmatmul.mubr.msk.f32.gmra.mxu1 %vm212_vm0, %v196_v36  ;;  %1079 = vmatprep.mubr.msk.f32.mxu0 %vm212_vm0, %v165_v37 }
  0x32   : > { %1127 = vmatprep.mubr.msk.f32.mxu1 %vm212_vm0, %v197_v38 }
  0x34   : > { %1080 = vmatmul.mubr.msk.f32.gmra.mxu0 %vm212_vm0, %v166_v39 }
  0x35   : > { %1128 = vmatmul.mubr.msk.f32.gmra.mxu1 %vm212_vm0, %v198_v40  ;;  %1082 = vmatprep.mubr.msk.f32.mxu0 %vm212_vm0, %v167_v41 }
  0x36   : > { %1130 = vmatprep.mubr.msk.f32.mxu1 %vm212_vm0, %v199_v42 }
  0x38   : > { %1083 = vmatmul.mubr.msk.f32.gmra.mxu0 %vm212_vm0, %v168_v43 }
  0x39   : > { %1131 = vmatmul.mubr.msk.f32.gmra.mxu1 %vm212_vm0, %v200_v44  ;;  %1085 = vmatprep.mubr.msk.f32.mxu0 %vm212_vm0, %v169_v45 }
  0x3a   : > { %1133 = vmatprep.mubr.msk.f32.mxu1 %vm212_vm0, %v201_v46 }
  0x3c   : > { %1086 = vmatmul.mubr.msk.f32.gmra.mxu0 %vm212_vm0, %v170_v47 }
  0x3d   : > { %1134 = vmatmul.mubr.msk.f32.gmra.mxu1 %vm212_vm0, %v202_v48  ;;  %1088 = vmatprep.mubr.msk.f32.mxu0 %vm212_vm0, %v171_v49 }
  0x3e   : > { %1136 = vmatprep.mubr.msk.f32.mxu1 %vm212_vm0, %v203_v50 }
  0x40   : > { %1089 = vmatmul.mubr.msk.f32.gmra.mxu0 %vm212_vm0, %v172_v51 }
  0x41   : > { %1137 = vmatmul.mubr.msk.f32.gmra.mxu1 %vm212_vm0, %v204_v52  ;;  %1091 = vmatprep.mubr.msk.f32.mxu0 %vm212_vm0, %v173_v53 }
  0x42   : > { %1139 = vmatprep.mubr.msk.f32.mxu1 %vm212_vm0, %v205_v54 }
  0x44   : > { %1092 = vmatmul.mubr.msk.f32.gmra.mxu0 %vm212_vm0, %v174_v55 }
  0x45   : > { %1140 = vmatmul.mubr.msk.f32.gmra.mxu1 %vm212_vm0, %v206_v56  ;;  %1094 = vmatprep.mubr.msk.f32.mxu0 %vm212_vm0, %v175_v57 }
  0x46   : > { %1142 = vmatprep.mubr.msk.f32.mxu1 %vm212_vm0, %v207_v58 }
  0x48   : > { %1095 = vmatmul.mubr.msk.f32.gmra.mxu0 %vm212_vm0, %v176_v59 }
  0x49   : > { %1143 = vmatmul.mubr.msk.f32.gmra.mxu1 %vm212_vm0, %v208_v60  ;;  %1097 = vmatprep.mubr.msk.f32.mxu0 %vm212_vm0, %v177_v61 }
  0x4a   : > { %1145 = vmatprep.mubr.msk.f32.mxu1 %vm212_vm0, %v209_v62 }
  0x4c   : > { %1098 = vmatmul.mubr.msk.f32.gmra.mxu0 %vm212_vm0, %v178_v63 }
  0x4d   : > { %1146 = vmatmul.mubr.msk.f32.gmra.mxu1 %vm212_vm0, %v210_v0 }
  0xd0   : > { %v1054_v1 = vpop.f32.mrf.mxu0 }
  0xd1   : > { %v1102_v2 = vpop.f32.mrf.mxu1  ;;  %791 = vst [vmem:[%s1335_s20 + $0x8] sm:$0xff] %v1054_v1 }
  0xd2   : > { %823 = vst [vmem:[%s1335_s20 + $0x108] sm:$0xff] %v1102_v2  ;;  %v471_v3 = vpop.f32.mrf.mxu0 }
  0xd3   : > { %v631_v4 = vpop.f32.mrf.mxu1  ;;  %790 = vst [vmem:[%s1335_s20] sm:$0xff] %v471_v3 }
  0xd4   : > { %822 = vst [vmem:[%s1335_s20 + $0x100] sm:$0xff] %v631_v4  ;;  %v1057_v5 = vpop.f32.mrf.mxu0 }
  0xd5   : > { %v1105_v6 = vpop.f32.mrf.mxu1  ;;  %793 = vst [vmem:[%s1335_s20 + $0x18] sm:$0xff] %v1057_v5 }
  0xd6   : > { %825 = vst [vmem:[%s1335_s20 + $0x118] sm:$0xff] %v1105_v6  ;;  %v481_v7 = vpop.f32.mrf.mxu0 }
  0xd7   : > { %v641_v8 = vpop.f32.mrf.mxu1  ;;  %792 = vst [vmem:[%s1335_s20 + $0x10] sm:$0xff] %v481_v7 }
  0xd8   : > { %824 = vst [vmem:[%s1335_s20 + $0x110] sm:$0xff] %v641_v8  ;;  %v1060_v9 = vpop.f32.mrf.mxu0 }
  0xd9   : > { %v1108_v10 = vpop.f32.mrf.mxu1  ;;  %795 = vst [vmem:[%s1335_s20 + $0x28] sm:$0xff] %v1060_v9 }
  0xda   : > { %827 = vst [vmem:[%s1335_s20 + $0x128] sm:$0xff] %v1108_v10  ;;  %v491_v11 = vpop.f32.mrf.mxu0 }
  0xdb   : > { %v651_v12 = vpop.f32.mrf.mxu1  ;;  %794 = vst [vmem:[%s1335_s20 + $0x20] sm:$0xff] %v491_v11 }
  0xdc   : > { %826 = vst [vmem:[%s1335_s20 + $0x120] sm:$0xff] %v651_v12  ;;  %v1063_v13 = vpop.f32.mrf.mxu0 }
  0xdd   : > { %v1111_v14 = vpop.f32.mrf.mxu1  ;;  %797 = vst [vmem:[%s1335_s20 + $0x38] sm:$0xff] %v1063_v13 }
  0xde   : > { %829 = vst [vmem:[%s1335_s20 + $0x138] sm:$0xff] %v1111_v14  ;;  %v501_v15 = vpop.f32.mrf.mxu0 }
  0xdf   : > { %v661_v16 = vpop.f32.mrf.mxu1  ;;  %796 = vst [vmem:[%s1335_s20 + $0x30] sm:$0xff] %v501_v15 }
  0xe0   : > { %828 = vst [vmem:[%s1335_s20 + $0x130] sm:$0xff] %v661_v16  ;;  %v1066_v17 = vpop.f32.mrf.mxu0 }
  0xe1   : > { %v1114_v18 = vpop.f32.mrf.mxu1  ;;  %799 = vst [vmem:[%s1335_s20 + $0x48] sm:$0xff] %v1066_v17 }
  0xe2   : > { %831 = vst [vmem:[%s1335_s20 + $0x148] sm:$0xff] %v1114_v18  ;;  %v511_v19 = vpop.f32.mrf.mxu0 }
  0xe3   : > { %v671_v20 = vpop.f32.mrf.mxu1  ;;  %798 = vst [vmem:[%s1335_s20 + $0x40] sm:$0xff] %v511_v19 }
  0xe4   : > { %830 = vst [vmem:[%s1335_s20 + $0x140] sm:$0xff] %v671_v20  ;;  %v1069_v21 = vpop.f32.mrf.mxu0 }
  0xe5   : > { %v1117_v22 = vpop.f32.mrf.mxu1  ;;  %801 = vst [vmem:[%s1335_s20 + $0x58] sm:$0xff] %v1069_v21 }
  0xe6   : > { %833 = vst [vmem:[%s1335_s20 + $0x158] sm:$0xff] %v1117_v22  ;;  %v521_v23 = vpop.f32.mrf.mxu0 }
  0xe7   : > { %v681_v24 = vpop.f32.mrf.mxu1  ;;  %800 = vst [vmem:[%s1335_s20 + $0x50] sm:$0xff] %v521_v23 }
  0xe8   : > { %832 = vst [vmem:[%s1335_s20 + $0x150] sm:$0xff] %v681_v24  ;;  %v1072_v25 = vpop.f32.mrf.mxu0 }
  0xe9   : > { %v1120_v26 = vpop.f32.mrf.mxu1  ;;  %803 = vst [vmem:[%s1335_s20 + $0x68] sm:$0xff] %v1072_v25 }
  0xea   : > { %835 = vst [vmem:[%s1335_s20 + $0x168] sm:$0xff] %v1120_v26  ;;  %v531_v27 = vpop.f32.mrf.mxu0 }
  0xeb   : > { %v691_v28 = vpop.f32.mrf.mxu1  ;;  %802 = vst [vmem:[%s1335_s20 + $0x60] sm:$0xff] %v531_v27 }
  0xec   : > { %834 = vst [vmem:[%s1335_s20 + $0x160] sm:$0xff] %v691_v28  ;;  %v1075_v29 = vpop.f32.mrf.mxu0 }
  0xed   : > { %v1123_v30 = vpop.f32.mrf.mxu1  ;;  %805 = vst [vmem:[%s1335_s20 + $0x78] sm:$0xff] %v1075_v29 }
  0xee   : > { %837 = vst [vmem:[%s1335_s20 + $0x178] sm:$0xff] %v1123_v30  ;;  %v541_v31 = vpop.f32.mrf.mxu0 }
  0xef   : > { %v701_v32 = vpop.f32.mrf.mxu1  ;;  %804 = vst [vmem:[%s1335_s20 + $0x70] sm:$0xff] %v541_v31 }
  0xf0   : > { %836 = vst [vmem:[%s1335_s20 + $0x170] sm:$0xff] %v701_v32  ;;  %v1078_v33 = vpop.f32.mrf.mxu0 }
  0xf1   : > { %v1126_v34 = vpop.f32.mrf.mxu1  ;;  %807 = vst [vmem:[%s1335_s20 + $0x88] sm:$0xff] %v1078_v33 }
  0xf2   : > { %839 = vst [vmem:[%s1335_s20 + $0x188] sm:$0xff] %v1126_v34  ;;  %v551_v35 = vpop.f32.mrf.mxu0 }
  0xf3   : > { %v711_v36 = vpop.f32.mrf.mxu1  ;;  %806 = vst [vmem:[%s1335_s20 + $0x80] sm:$0xff] %v551_v35 }
  0xf4   : > { %838 = vst [vmem:[%s1335_s20 + $0x180] sm:$0xff] %v711_v36  ;;  %v1081_v37 = vpop.f32.mrf.mxu0 }
  0xf5   : > { %v1129_v38 = vpop.f32.mrf.mxu1  ;;  %809 = vst [vmem:[%s1335_s20 + $0x98] sm:$0xff] %v1081_v37 }
  0xf6   : > { %841 = vst [vmem:[%s1335_s20 + $0x198] sm:$0xff] %v1129_v38  ;;  %v561_v39 = vpop.f32.mrf.mxu0 }
  0xf7   : > { %v721_v40 = vpop.f32.mrf.mxu1  ;;  %808 = vst [vmem:[%s1335_s20 + $0x90] sm:$0xff] %v561_v39 }
  0xf8   : > { %840 = vst [vmem:[%s1335_s20 + $0x190] sm:$0xff] %v721_v40  ;;  %v1084_v41 = vpop.f32.mrf.mxu0 }
  0xf9   : > { %v1132_v42 = vpop.f32.mrf.mxu1  ;;  %811 = vst [vmem:[%s1335_s20 + $0xa8] sm:$0xff] %v1084_v41 }
  0xfa   : > { %843 = vst [vmem:[%s1335_s20 + $0x1a8] sm:$0xff] %v1132_v42  ;;  %v571_v43 = vpop.f32.mrf.mxu0 }
  0xfb   : > { %v731_v44 = vpop.f32.mrf.mxu1  ;;  %810 = vst [vmem:[%s1335_s20 + $0xa0] sm:$0xff] %v571_v43 }
  0xfc   : > { %842 = vst [vmem:[%s1335_s20 + $0x1a0] sm:$0xff] %v731_v44  ;;  %v1087_v45 = vpop.f32.mrf.mxu0 }
  0xfd   : > { %v1135_v46 = vpop.f32.mrf.mxu1  ;;  %813 = vst [vmem:[%s1335_s20 + $0xb8] sm:$0xff] %v1087_v45 }
  0xfe   : > { %845 = vst [vmem:[%s1335_s20 + $0x1b8] sm:$0xff] %v1135_v46  ;;  %v581_v47 = vpop.f32.mrf.mxu0 }
  0xff   : > { %v741_v48 = vpop.f32.mrf.mxu1  ;;  %812 = vst [vmem:[%s1335_s20 + $0xb0] sm:$0xff] %v581_v47 }
 0x100   : > { %844 = vst [vmem:[%s1335_s20 + $0x1b0] sm:$0xff] %v741_v48  ;;  %v1090_v49 = vpop.f32.mrf.mxu0 }
 0x101   : > { %v1138_v50 = vpop.f32.mrf.mxu1  ;;  %815 = vst [vmem:[%s1335_s20 + $0xc8] sm:$0xff] %v1090_v49 }
 0x102   : > { %847 = vst [vmem:[%s1335_s20 + $0x1c8] sm:$0xff] %v1138_v50  ;;  %v591_v51 = vpop.f32.mrf.mxu0 }
 0x103   : > { %v751_v52 = vpop.f32.mrf.mxu1  ;;  %814 = vst [vmem:[%s1335_s20 + $0xc0] sm:$0xff] %v591_v51 }
 0x104   : > { %846 = vst [vmem:[%s1335_s20 + $0x1c0] sm:$0xff] %v751_v52  ;;  %v1093_v53 = vpop.f32.mrf.mxu0 }
 0x105   : > { %v1141_v54 = vpop.f32.mrf.mxu1  ;;  %817 = vst [vmem:[%s1335_s20 + $0xd8] sm:$0xff] %v1093_v53 }
 0x106   : > { %849 = vst [vmem:[%s1335_s20 + $0x1d8] sm:$0xff] %v1141_v54  ;;  %v601_v55 = vpop.f32.mrf.mxu0 }
 0x107   : > { %v761_v56 = vpop.f32.mrf.mxu1  ;;  %816 = vst [vmem:[%s1335_s20 + $0xd0] sm:$0xff] %v601_v55 }
 0x108   : > { %848 = vst [vmem:[%s1335_s20 + $0x1d0] sm:$0xff] %v761_v56  ;;  %v1096_v57 = vpop.f32.mrf.mxu0 }
 0x109   : > { %v1144_v58 = vpop.f32.mrf.mxu1  ;;  %819 = vst [vmem:[%s1335_s20 + $0xe8] sm:$0xff] %v1096_v57 }
 0x10a   : > { %851 = vst [vmem:[%s1335_s20 + $0x1e8] sm:$0xff] %v1144_v58  ;;  %v611_v59 = vpop.f32.mrf.mxu0 }
 0x10b   : > { %v771_v60 = vpop.f32.mrf.mxu1  ;;  %818 = vst [vmem:[%s1335_s20 + $0xe0] sm:$0xff] %v611_v59 }
 0x10c   : > { %850 = vst [vmem:[%s1335_s20 + $0x1e0] sm:$0xff] %v771_v60  ;;  %v1099_v61 = vpop.f32.mrf.mxu0 }
 0x10d   : > { %v1147_v62 = vpop.f32.mrf.mxu1  ;;  %821 = vst [vmem:[%s1335_s20 + $0xf8] sm:$0xff] %v1099_v61 }
 0x10e   : > { %853 = vst [vmem:[%s1335_s20 + $0x1f8] sm:$0xff] %v1147_v62  ;;  %v621_v63 = vpop.f32.mrf.mxu0 }
 0x10f   : > { %v781_v0 = vpop.f32.mrf.mxu1  ;;  %820 = vst [vmem:[%s1335_s20 + $0xf0] sm:$0xff] %v621_v63 }
 0x110   : > { %852 = vst [vmem:[%s1335_s20 + $0x1f0] sm:$0xff] %v781_v0 }
 0x111 PF: > { %s12_s9 = sadd.s32 1, %s1164_s9  }
 0x112   : > { %p9_p4 = scmp.ge.s32.totalorder %s12_s9, 4  }
 0x114   :  { %11 = sbr.rel (!%p9_p4) target bundleno = 1 (0x1), region = 58 }

// kernel: forward.7
= control target key start
LH: loop header
LB: loop body
LE: loop exit
PB: predicated region body
PF: predicated region fallthrough
CT: control target
= control target key end

     0   :  { %s1186_s9 = smov 0   ;;  %s1409_s0 = inlined_call_operand.vmem [shape: f32[8192,4], index: 0, kind: input, shape index: {}]   ;;  %s1410_s1 = inlined_call_operand.vmem [shape: f32[4,128], index: 1, kind: input, shape index: {}]   ;;  %s1411_s2 = inlined_call_operand.vmem [shape: f32[8192,128], index: 2, kind: output, shape index: {}]  }
   0x1 LB: > { %s914_s10 = sadd.s32 4294967295, %s1169_s9   ;;  %p918_p0 = scmp.ge.s32.totalorder %s1169_s9, 1  ;;  %s1169_s9 = sphi %s1186_s9, %s12_s9  }
   0x2   : > { %p113_p1 = scmp.lt.s32.totalorder %s1169_s9, 17 }
   0x4   : > { %p114_p2 = pnand %p918_p0, %p113_p1 }
   0x5   : > { %s919_s13 = sshll.u32 (!%p114_p2), %s914_s10, 6 }
   0x6   : > { %117 = sbr.rel (%p114_p2) target bundleno = 273 (0x111), region = 28  ;;  %p136_p3 = scmp.lt.s32.totalorder (!%p114_p2), %s919_s13, 1023 }
   0xb   : > { %v211_v0 = vld [vmem:[%s1410_s1] sm:$0xf]  ;;  %vm405_vm0 = vcmask 1043456   ;;  %s1413_s13 = smov (!%p136_p3, %s919_s13), 1023  ;;  %vm212_vm1 = vcmask 31744  }
   0xc   : > { %1055 = vmatprep.subr.msk.mxu0 %vm405_vm0, %v211_v0  ;;  %1153 = vmatprep.subr.msk.mxu1 %vm405_vm0, %v211_v0  ;;  %s920_s14 = sshll.u32 %s1413_s13, 3 }
   0xd   : > { %1056 = vmatpush3.msk.msra.mxu0 %vm405_vm0, %v211_v0  ;;  %1154 = vmatpush3.msk.msra.mxu1 %vm405_vm0, %v211_v0  ;;  %s1205_s17 = scalar_lea.vmem %s1409_s0, %s920_s14  ;;  %s1340_s20 = scalar_lea.vmem %s1411_s2, %s920_s14 }
   0xe   : > { %v147_v1 = vld [vmem:[%s1205_s17] sm:$0xff]  ;;  %v148_v3 = vld [vmem:[%s1205_s17 + $0x8] sm:$0xff]  ;;  %v149_v5 = vld [vmem:[%s1205_s17 + $0x10] sm:$0xff] }
   0xf   : > { %v179_v2 = vld [vmem:[%s1205_s17 + $0x100] sm:$0xff]  ;;  %1057 = vmatprep.mubr.msk.f32.mxu0 %vm212_vm1, %v147_v1  ;;  %v180_v4 = vld [vmem:[%s1205_s17 + $0x108] sm:$0xff]  ;;  %v181_v6 = vld [vmem:[%s1205_s17 + $0x110] sm:$0xff] }
  0x10   : > { %1105 = vmatprep.mubr.msk.f32.mxu1 %vm212_vm1, %v179_v2  ;;  %1058 = vmatmul.mubr.msk.f32.vlgmr.msra.gmra.mxu0 %vm212_vm1, %v148_v3  ;;  %v150_v7 = vld [vmem:[%s1205_s17 + $0x18] sm:$0xff]  ;;  %v151_v9 = vld [vmem:[%s1205_s17 + $0x20] sm:$0xff]  ;;  %v152_v11 = vld [vmem:[%s1205_s17 + $0x28] sm:$0xff] }
  0x11   : > { %1106 = vmatmul.mubr.msk.f32.vlgmr.msra.gmra.mxu1 %vm212_vm1, %v180_v4  ;;  %1060 = vmatprep.mubr.msk.f32.mxu0 %vm212_vm1, %v149_v5  ;;  %v182_v8 = vld [vmem:[%s1205_s17 + $0x118] sm:$0xff]  ;;  %v183_v10 = vld [vmem:[%s1205_s17 + $0x120] sm:$0xff]  ;;  %v184_v12 = vld [vmem:[%s1205_s17 + $0x128] sm:$0xff] }
  0x12   : > { %1108 = vmatprep.mubr.msk.f32.mxu1 %vm212_vm1, %v181_v6  ;;  %v153_v13 = vld [vmem:[%s1205_s17 + $0x30] sm:$0xff]  ;;  %v154_v15 = vld [vmem:[%s1205_s17 + $0x38] sm:$0xff]  ;;  %v155_v17 = vld [vmem:[%s1205_s17 + $0x40] sm:$0xff] }
  0x13   : > { %v185_v14 = vld [vmem:[%s1205_s17 + $0x130] sm:$0xff]  ;;  %v186_v16 = vld [vmem:[%s1205_s17 + $0x138] sm:$0xff]  ;;  %v187_v18 = vld [vmem:[%s1205_s17 + $0x140] sm:$0xff] }
  0x14   : > { %1061 = vmatmul.mubr.msk.f32.gmra.mxu0 %vm212_vm1, %v150_v7  ;;  %v156_v19 = vld [vmem:[%s1205_s17 + $0x48] sm:$0xff]  ;;  %v157_v21 = vld [vmem:[%s1205_s17 + $0x50] sm:$0xff]  ;;  %v158_v23 = vld [vmem:[%s1205_s17 + $0x58] sm:$0xff] }
  0x15   : > { %1109 = vmatmul.mubr.msk.f32.gmra.mxu1 %vm212_vm1, %v182_v8  ;;  %1063 = vmatprep.mubr.msk.f32.mxu0 %vm212_vm1, %v151_v9  ;;  %v188_v20 = vld [vmem:[%s1205_s17 + $0x148] sm:$0xff]  ;;  %v189_v22 = vld [vmem:[%s1205_s17 + $0x150] sm:$0xff]  ;;  %v190_v24 = vld [vmem:[%s1205_s17 + $0x158] sm:$0xff] }
  0x16   : > { %1111 = vmatprep.mubr.msk.f32.mxu1 %vm212_vm1, %v183_v10  ;;  %v159_v25 = vld [vmem:[%s1205_s17 + $0x60] sm:$0xff]  ;;  %v160_v27 = vld [vmem:[%s1205_s17 + $0x68] sm:$0xff]  ;;  %v161_v29 = vld [vmem:[%s1205_s17 + $0x70] sm:$0xff] }
  0x17   : > { %v191_v26 = vld [vmem:[%s1205_s17 + $0x160] sm:$0xff]  ;;  %v192_v28 = vld [vmem:[%s1205_s17 + $0x168] sm:$0xff]  ;;  %v193_v30 = vld [vmem:[%s1205_s17 + $0x170] sm:$0xff] }
  0x18   : > { %1064 = vmatmul.mubr.msk.f32.gmra.mxu0 %vm212_vm1, %v152_v11  ;;  %v162_v31 = vld [vmem:[%s1205_s17 + $0x78] sm:$0xff]  ;;  %v163_v33 = vld [vmem:[%s1205_s17 + $0x80] sm:$0xff]  ;;  %v164_v35 = vld [vmem:[%s1205_s17 + $0x88] sm:$0xff] }
  0x19   : > { %1112 = vmatmul.mubr.msk.f32.gmra.mxu1 %vm212_vm1, %v184_v12  ;;  %1066 = vmatprep.mubr.msk.f32.mxu0 %vm212_vm1, %v153_v13  ;;  %v194_v32 = vld [vmem:[%s1205_s17 + $0x178] sm:$0xff]  ;;  %v195_v34 = vld [vmem:[%s1205_s17 + $0x180] sm:$0xff]  ;;  %v196_v36 = vld [vmem:[%s1205_s17 + $0x188] sm:$0xff] }
  0x1a   : > { %1114 = vmatprep.mubr.msk.f32.mxu1 %vm212_vm1, %v185_v14  ;;  %v165_v37 = vld [vmem:[%s1205_s17 + $0x90] sm:$0xff]  ;;  %v166_v39 = vld [vmem:[%s1205_s17 + $0x98] sm:$0xff]  ;;  %v167_v41 = vld [vmem:[%s1205_s17 + $0xa0] sm:$0xff] }
  0x1b   : > { %v197_v38 = vld [vmem:[%s1205_s17 + $0x190] sm:$0xff]  ;;  %v198_v40 = vld [vmem:[%s1205_s17 + $0x198] sm:$0xff]  ;;  %v199_v42 = vld [vmem:[%s1205_s17 + $0x1a0] sm:$0xff] }
  0x1c   : > { %1067 = vmatmul.mubr.msk.f32.gmra.mxu0 %vm212_vm1, %v154_v15  ;;  %v168_v43 = vld [vmem:[%s1205_s17 + $0xa8] sm:$0xff]  ;;  %v169_v45 = vld [vmem:[%s1205_s17 + $0xb0] sm:$0xff]  ;;  %v170_v47 = vld [vmem:[%s1205_s17 + $0xb8] sm:$0xff] }
  0x1d   : > { %1115 = vmatmul.mubr.msk.f32.gmra.mxu1 %vm212_vm1, %v186_v16  ;;  %1069 = vmatprep.mubr.msk.f32.mxu0 %vm212_vm1, %v155_v17  ;;  %v200_v44 = vld [vmem:[%s1205_s17 + $0x1a8] sm:$0xff]  ;;  %v201_v46 = vld [vmem:[%s1205_s17 + $0x1b0] sm:$0xff]  ;;  %v202_v48 = vld [vmem:[%s1205_s17 + $0x1b8] sm:$0xff] }
  0x1e   : > { %1117 = vmatprep.mubr.msk.f32.mxu1 %vm212_vm1, %v187_v18  ;;  %v171_v49 = vld [vmem:[%s1205_s17 + $0xc0] sm:$0xff]  ;;  %v172_v51 = vld [vmem:[%s1205_s17 + $0xc8] sm:$0xff]  ;;  %v173_v53 = vld [vmem:[%s1205_s17 + $0xd0] sm:$0xff] }
  0x1f   : > { %v203_v50 = vld [vmem:[%s1205_s17 + $0x1c0] sm:$0xff]  ;;  %v204_v52 = vld [vmem:[%s1205_s17 + $0x1c8] sm:$0xff]  ;;  %v205_v54 = vld [vmem:[%s1205_s17 + $0x1d0] sm:$0xff] }
  0x20   : > { %1070 = vmatmul.mubr.msk.f32.gmra.mxu0 %vm212_vm1, %v156_v19  ;;  %v174_v55 = vld [vmem:[%s1205_s17 + $0xd8] sm:$0xff]  ;;  %v175_v57 = vld [vmem:[%s1205_s17 + $0xe0] sm:$0xff]  ;;  %v176_v59 = vld [vmem:[%s1205_s17 + $0xe8] sm:$0xff] }
  0x21   : > { %1118 = vmatmul.mubr.msk.f32.gmra.mxu1 %vm212_vm1, %v188_v20  ;;  %1072 = vmatprep.mubr.msk.f32.mxu0 %vm212_vm1, %v157_v21  ;;  %v206_v56 = vld [vmem:[%s1205_s17 + $0x1d8] sm:$0xff]  ;;  %v207_v58 = vld [vmem:[%s1205_s17 + $0x1e0] sm:$0xff]  ;;  %v208_v60 = vld [vmem:[%s1205_s17 + $0x1e8] sm:$0xff] }
  0x22   : > { %1120 = vmatprep.mubr.msk.f32.mxu1 %vm212_vm1, %v189_v22  ;;  %v177_v61 = vld [vmem:[%s1205_s17 + $0xf0] sm:$0xff]  ;;  %v178_v63 = vld [vmem:[%s1205_s17 + $0xf8] sm:$0xff] }
  0x23   : > { %v209_v62 = vld [vmem:[%s1205_s17 + $0x1f0] sm:$0xff]  ;;  %v210_v0 = vld [vmem:[%s1205_s17 + $0x1f8] sm:$0xff] }
  0x24   : > { %1073 = vmatmul.mubr.msk.f32.gmra.mxu0 %vm212_vm1, %v158_v23 }
  0x25   : > { %1121 = vmatmul.mubr.msk.f32.gmra.mxu1 %vm212_vm1, %v190_v24  ;;  %1075 = vmatprep.mubr.msk.f32.mxu0 %vm212_vm1, %v159_v25 }
  0x26   : > { %1123 = vmatprep.mubr.msk.f32.mxu1 %vm212_vm1, %v191_v26 }
  0x28   : > { %1076 = vmatmul.mubr.msk.f32.gmra.mxu0 %vm212_vm1, %v160_v27 }
  0x29   : > { %1124 = vmatmul.mubr.msk.f32.gmra.mxu1 %vm212_vm1, %v192_v28  ;;  %1078 = vmatprep.mubr.msk.f32.mxu0 %vm212_vm1, %v161_v29 }
  0x2a   : > { %1126 = vmatprep.mubr.msk.f32.mxu1 %vm212_vm1, %v193_v30 }
  0x2c   : > { %1079 = vmatmul.mubr.msk.f32.gmra.mxu0 %vm212_vm1, %v162_v31 }
  0x2d   : > { %1127 = vmatmul.mubr.msk.f32.gmra.mxu1 %vm212_vm1, %v194_v32  ;;  %1081 = vmatprep.mubr.msk.f32.mxu0 %vm212_vm1, %v163_v33 }
  0x2e   : > { %1129 = vmatprep.mubr.msk.f32.mxu1 %vm212_vm1, %v195_v34 }
  0x30   : > { %1082 = vmatmul.mubr.msk.f32.gmra.mxu0 %vm212_vm1, %v164_v35 }
  0x31   : > { %1130 = vmatmul.mubr.msk.f32.gmra.mxu1 %vm212_vm1, %v196_v36  ;;  %1084 = vmatprep.mubr.msk.f32.mxu0 %vm212_vm1, %v165_v37 }
  0x32   : > { %1132 = vmatprep.mubr.msk.f32.mxu1 %vm212_vm1, %v197_v38 }
  0x34   : > { %1085 = vmatmul.mubr.msk.f32.gmra.mxu0 %vm212_vm1, %v166_v39 }
  0x35   : > { %1133 = vmatmul.mubr.msk.f32.gmra.mxu1 %vm212_vm1, %v198_v40  ;;  %1087 = vmatprep.mubr.msk.f32.mxu0 %vm212_vm1, %v167_v41 }
  0x36   : > { %1135 = vmatprep.mubr.msk.f32.mxu1 %vm212_vm1, %v199_v42 }
  0x38   : > { %1088 = vmatmul.mubr.msk.f32.gmra.mxu0 %vm212_vm1, %v168_v43 }
  0x39   : > { %1136 = vmatmul.mubr.msk.f32.gmra.mxu1 %vm212_vm1, %v200_v44  ;;  %1090 = vmatprep.mubr.msk.f32.mxu0 %vm212_vm1, %v169_v45 }
  0x3a   : > { %1138 = vmatprep.mubr.msk.f32.mxu1 %vm212_vm1, %v201_v46 }
  0x3c   : > { %1091 = vmatmul.mubr.msk.f32.gmra.mxu0 %vm212_vm1, %v170_v47 }
  0x3d   : > { %1139 = vmatmul.mubr.msk.f32.gmra.mxu1 %vm212_vm1, %v202_v48  ;;  %1093 = vmatprep.mubr.msk.f32.mxu0 %vm212_vm1, %v171_v49 }
  0x3e   : > { %1141 = vmatprep.mubr.msk.f32.mxu1 %vm212_vm1, %v203_v50 }
  0x40   : > { %1094 = vmatmul.mubr.msk.f32.gmra.mxu0 %vm212_vm1, %v172_v51 }
  0x41   : > { %1142 = vmatmul.mubr.msk.f32.gmra.mxu1 %vm212_vm1, %v204_v52  ;;  %1096 = vmatprep.mubr.msk.f32.mxu0 %vm212_vm1, %v173_v53 }
  0x42   : > { %1144 = vmatprep.mubr.msk.f32.mxu1 %vm212_vm1, %v205_v54 }
  0x44   : > { %1097 = vmatmul.mubr.msk.f32.gmra.mxu0 %vm212_vm1, %v174_v55 }
  0x45   : > { %1145 = vmatmul.mubr.msk.f32.gmra.mxu1 %vm212_vm1, %v206_v56  ;;  %1099 = vmatprep.mubr.msk.f32.mxu0 %vm212_vm1, %v175_v57 }
  0x46   : > { %1147 = vmatprep.mubr.msk.f32.mxu1 %vm212_vm1, %v207_v58 }
  0x48   : > { %1100 = vmatmul.mubr.msk.f32.gmra.mxu0 %vm212_vm1, %v176_v59 }
  0x49   : > { %1148 = vmatmul.mubr.msk.f32.gmra.mxu1 %vm212_vm1, %v208_v60  ;;  %1102 = vmatprep.mubr.msk.f32.mxu0 %vm212_vm1, %v177_v61 }
  0x4a   : > { %1150 = vmatprep.mubr.msk.f32.mxu1 %vm212_vm1, %v209_v62 }
  0x4c   : > { %1103 = vmatmul.mubr.msk.f32.gmra.mxu0 %vm212_vm1, %v178_v63 }
  0x4d   : > { %1151 = vmatmul.mubr.msk.f32.gmra.mxu1 %vm212_vm1, %v210_v0 }
  0xd0   : > { %v1059_v1 = vpop.f32.mrf.mxu0 }
  0xd1   : > { %v1107_v2 = vpop.f32.mrf.mxu1  ;;  %795 = vst [vmem:[%s1340_s20 + $0x8] sm:$0xff] %v1059_v1 }
  0xd2   : > { %827 = vst [vmem:[%s1340_s20 + $0x108] sm:$0xff] %v1107_v2  ;;  %v475_v3 = vpop.f32.mrf.mxu0 }
  0xd3   : > { %v635_v4 = vpop.f32.mrf.mxu1  ;;  %794 = vst [vmem:[%s1340_s20] sm:$0xff] %v475_v3 }
  0xd4   : > { %826 = vst [vmem:[%s1340_s20 + $0x100] sm:$0xff] %v635_v4  ;;  %v1062_v5 = vpop.f32.mrf.mxu0 }
  0xd5   : > { %v1110_v6 = vpop.f32.mrf.mxu1  ;;  %797 = vst [vmem:[%s1340_s20 + $0x18] sm:$0xff] %v1062_v5 }
  0xd6   : > { %829 = vst [vmem:[%s1340_s20 + $0x118] sm:$0xff] %v1110_v6  ;;  %v485_v7 = vpop.f32.mrf.mxu0 }
  0xd7   : > { %v645_v8 = vpop.f32.mrf.mxu1  ;;  %796 = vst [vmem:[%s1340_s20 + $0x10] sm:$0xff] %v485_v7 }
  0xd8   : > { %828 = vst [vmem:[%s1340_s20 + $0x110] sm:$0xff] %v645_v8  ;;  %v1065_v9 = vpop.f32.mrf.mxu0 }
  0xd9   : > { %v1113_v10 = vpop.f32.mrf.mxu1  ;;  %799 = vst [vmem:[%s1340_s20 + $0x28] sm:$0xff] %v1065_v9 }
  0xda   : > { %831 = vst [vmem:[%s1340_s20 + $0x128] sm:$0xff] %v1113_v10  ;;  %v495_v11 = vpop.f32.mrf.mxu0 }
  0xdb   : > { %v655_v12 = vpop.f32.mrf.mxu1  ;;  %798 = vst [vmem:[%s1340_s20 + $0x20] sm:$0xff] %v495_v11 }
  0xdc   : > { %830 = vst [vmem:[%s1340_s20 + $0x120] sm:$0xff] %v655_v12  ;;  %v1068_v13 = vpop.f32.mrf.mxu0 }
  0xdd   : > { %v1116_v14 = vpop.f32.mrf.mxu1  ;;  %801 = vst [vmem:[%s1340_s20 + $0x38] sm:$0xff] %v1068_v13 }
  0xde   : > { %833 = vst [vmem:[%s1340_s20 + $0x138] sm:$0xff] %v1116_v14  ;;  %v505_v15 = vpop.f32.mrf.mxu0 }
  0xdf   : > { %v665_v16 = vpop.f32.mrf.mxu1  ;;  %800 = vst [vmem:[%s1340_s20 + $0x30] sm:$0xff] %v505_v15 }
  0xe0   : > { %832 = vst [vmem:[%s1340_s20 + $0x130] sm:$0xff] %v665_v16  ;;  %v1071_v17 = vpop.f32.mrf.mxu0 }
  0xe1   : > { %v1119_v18 = vpop.f32.mrf.mxu1  ;;  %803 = vst [vmem:[%s1340_s20 + $0x48] sm:$0xff] %v1071_v17 }
  0xe2   : > { %835 = vst [vmem:[%s1340_s20 + $0x148] sm:$0xff] %v1119_v18  ;;  %v515_v19 = vpop.f32.mrf.mxu0 }
  0xe3   : > { %v675_v20 = vpop.f32.mrf.mxu1  ;;  %802 = vst [vmem:[%s1340_s20 + $0x40] sm:$0xff] %v515_v19 }
  0xe4   : > { %834 = vst [vmem:[%s1340_s20 + $0x140] sm:$0xff] %v675_v20  ;;  %v1074_v21 = vpop.f32.mrf.mxu0 }
  0xe5   : > { %v1122_v22 = vpop.f32.mrf.mxu1  ;;  %805 = vst [vmem:[%s1340_s20 + $0x58] sm:$0xff] %v1074_v21 }
  0xe6   : > { %837 = vst [vmem:[%s1340_s20 + $0x158] sm:$0xff] %v1122_v22  ;;  %v525_v23 = vpop.f32.mrf.mxu0 }
  0xe7   : > { %v685_v24 = vpop.f32.mrf.mxu1  ;;  %804 = vst [vmem:[%s1340_s20 + $0x50] sm:$0xff] %v525_v23 }
  0xe8   : > { %836 = vst [vmem:[%s1340_s20 + $0x150] sm:$0xff] %v685_v24  ;;  %v1077_v25 = vpop.f32.mrf.mxu0 }
  0xe9   : > { %v1125_v26 = vpop.f32.mrf.mxu1  ;;  %807 = vst [vmem:[%s1340_s20 + $0x68] sm:$0xff] %v1077_v25 }
  0xea   : > { %839 = vst [vmem:[%s1340_s20 + $0x168] sm:$0xff] %v1125_v26  ;;  %v535_v27 = vpop.f32.mrf.mxu0 }
  0xeb   : > { %v695_v28 = vpop.f32.mrf.mxu1  ;;  %806 = vst [vmem:[%s1340_s20 + $0x60] sm:$0xff] %v535_v27 }
  0xec   : > { %838 = vst [vmem:[%s1340_s20 + $0x160] sm:$0xff] %v695_v28  ;;  %v1080_v29 = vpop.f32.mrf.mxu0 }
  0xed   : > { %v1128_v30 = vpop.f32.mrf.mxu1  ;;  %809 = vst [vmem:[%s1340_s20 + $0x78] sm:$0xff] %v1080_v29 }
  0xee   : > { %841 = vst [vmem:[%s1340_s20 + $0x178] sm:$0xff] %v1128_v30  ;;  %v545_v31 = vpop.f32.mrf.mxu0 }
  0xef   : > { %v705_v32 = vpop.f32.mrf.mxu1  ;;  %808 = vst [vmem:[%s1340_s20 + $0x70] sm:$0xff] %v545_v31 }
  0xf0   : > { %840 = vst [vmem:[%s1340_s20 + $0x170] sm:$0xff] %v705_v32  ;;  %v1083_v33 = vpop.f32.mrf.mxu0 }
  0xf1   : > { %v1131_v34 = vpop.f32.mrf.mxu1  ;;  %811 = vst [vmem:[%s1340_s20 + $0x88] sm:$0xff] %v1083_v33 }
  0xf2   : > { %843 = vst [vmem:[%s1340_s20 + $0x188] sm:$0xff] %v1131_v34  ;;  %v555_v35 = vpop.f32.mrf.mxu0 }
  0xf3   : > { %v715_v36 = vpop.f32.mrf.mxu1  ;;  %810 = vst [vmem:[%s1340_s20 + $0x80] sm:$0xff] %v555_v35 }
  0xf4   : > { %842 = vst [vmem:[%s1340_s20 + $0x180] sm:$0xff] %v715_v36  ;;  %v1086_v37 = vpop.f32.mrf.mxu0 }
  0xf5   : > { %v1134_v38 = vpop.f32.mrf.mxu1  ;;  %813 = vst [vmem:[%s1340_s20 + $0x98] sm:$0xff] %v1086_v37 }
  0xf6   : > { %845 = vst [vmem:[%s1340_s20 + $0x198] sm:$0xff] %v1134_v38  ;;  %v565_v39 = vpop.f32.mrf.mxu0 }
  0xf7   : > { %v725_v40 = vpop.f32.mrf.mxu1  ;;  %812 = vst [vmem:[%s1340_s20 + $0x90] sm:$0xff] %v565_v39 }
  0xf8   : > { %844 = vst [vmem:[%s1340_s20 + $0x190] sm:$0xff] %v725_v40  ;;  %v1089_v41 = vpop.f32.mrf.mxu0 }
  0xf9   : > { %v1137_v42 = vpop.f32.mrf.mxu1  ;;  %815 = vst [vmem:[%s1340_s20 + $0xa8] sm:$0xff] %v1089_v41 }
  0xfa   : > { %847 = vst [vmem:[%s1340_s20 + $0x1a8] sm:$0xff] %v1137_v42  ;;  %v575_v43 = vpop.f32.mrf.mxu0 }
  0xfb   : > { %v735_v44 = vpop.f32.mrf.mxu1  ;;  %814 = vst [vmem:[%s1340_s20 + $0xa0] sm:$0xff] %v575_v43 }
  0xfc   : > { %846 = vst [vmem:[%s1340_s20 + $0x1a0] sm:$0xff] %v735_v44  ;;  %v1092_v45 = vpop.f32.mrf.mxu0 }
  0xfd   : > { %v1140_v46 = vpop.f32.mrf.mxu1  ;;  %817 = vst [vmem:[%s1340_s20 + $0xb8] sm:$0xff] %v1092_v45 }
  0xfe   : > { %849 = vst [vmem:[%s1340_s20 + $0x1b8] sm:$0xff] %v1140_v46  ;;  %v585_v47 = vpop.f32.mrf.mxu0 }
  0xff   : > { %v745_v48 = vpop.f32.mrf.mxu1  ;;  %816 = vst [vmem:[%s1340_s20 + $0xb0] sm:$0xff] %v585_v47 }
 0x100   : > { %848 = vst [vmem:[%s1340_s20 + $0x1b0] sm:$0xff] %v745_v48  ;;  %v1095_v49 = vpop.f32.mrf.mxu0 }
 0x101   : > { %v1143_v50 = vpop.f32.mrf.mxu1  ;;  %819 = vst [vmem:[%s1340_s20 + $0xc8] sm:$0xff] %v1095_v49 }
 0x102   : > { %851 = vst [vmem:[%s1340_s20 + $0x1c8] sm:$0xff] %v1143_v50  ;;  %v595_v51 = vpop.f32.mrf.mxu0 }
 0x103   : > { %v755_v52 = vpop.f32.mrf.mxu1  ;;  %818 = vst [vmem:[%s1340_s20 + $0xc0] sm:$0xff] %v595_v51 }
 0x104   : > { %850 = vst [vmem:[%s1340_s20 + $0x1c0] sm:$0xff] %v755_v52  ;;  %v1098_v53 = vpop.f32.mrf.mxu0 }
 0x105   : > { %v1146_v54 = vpop.f32.mrf.mxu1  ;;  %821 = vst [vmem:[%s1340_s20 + $0xd8] sm:$0xff] %v1098_v53 }
 0x106   : > { %853 = vst [vmem:[%s1340_s20 + $0x1d8] sm:$0xff] %v1146_v54  ;;  %v605_v55 = vpop.f32.mrf.mxu0 }
 0x107   : > { %v765_v56 = vpop.f32.mrf.mxu1  ;;  %820 = vst [vmem:[%s1340_s20 + $0xd0] sm:$0xff] %v605_v55 }
 0x108   : > { %852 = vst [vmem:[%s1340_s20 + $0x1d0] sm:$0xff] %v765_v56  ;;  %v1101_v57 = vpop.f32.mrf.mxu0 }
 0x109   : > { %v1149_v58 = vpop.f32.mrf.mxu1  ;;  %823 = vst [vmem:[%s1340_s20 + $0xe8] sm:$0xff] %v1101_v57 }
 0x10a   : > { %855 = vst [vmem:[%s1340_s20 + $0x1e8] sm:$0xff] %v1149_v58  ;;  %v615_v59 = vpop.f32.mrf.mxu0 }
 0x10b   : > { %v775_v60 = vpop.f32.mrf.mxu1  ;;  %822 = vst [vmem:[%s1340_s20 + $0xe0] sm:$0xff] %v615_v59 }
 0x10c   : > { %854 = vst [vmem:[%s1340_s20 + $0x1e0] sm:$0xff] %v775_v60  ;;  %v1104_v61 = vpop.f32.mrf.mxu0 }
 0x10d   : > { %v1152_v62 = vpop.f32.mrf.mxu1  ;;  %825 = vst [vmem:[%s1340_s20 + $0xf8] sm:$0xff] %v1104_v61 }
 0x10e   : > { %857 = vst [vmem:[%s1340_s20 + $0x1f8] sm:$0xff] %v1152_v62  ;;  %v625_v63 = vpop.f32.mrf.mxu0 }
 0x10f   : > { %v785_v0 = vpop.f32.mrf.mxu1  ;;  %824 = vst [vmem:[%s1340_s20 + $0xf0] sm:$0xff] %v625_v63 }
 0x110   : > { %856 = vst [vmem:[%s1340_s20 + $0x1f0] sm:$0xff] %v785_v0 }
 0x111 PF: > { %s12_s9 = sadd.s32 1, %s1169_s9  }
 0x112   : > { %p9_p4 = scmp.ge.s32.totalorder %s12_s9, 18  }
 0x114   :  { %11 = sbr.rel (!%p9_p4) target bundleno = 1 (0x1), region = 58 }

</bundles_post_ra>
